<compile_context>
chip_gen: v5e
topology: v5e:2x2
jax: 0.10.0
libtpu: 0.0.40
codegen_flags: <defaults>
</compile_context>

<pallas_src>
import functools

import jax
import jax.numpy as jnp
from jax.experimental import pallas as pl
from jax.experimental.pallas import tpu as pltpu

KERNEL_SIZE = 7

# Keep the live (b_tile, H*W) sum/max carries plus one streamed 8-channel
# chunk comfortably inside the 64-entry vector register file (no spills).
_MAX_CARRY_ELEMS = 8192

# Finite "-inf" sentinel: survives 0 * x in the selection matmul (a true -inf
# would make 0 * -inf = NaN) and is exactly representable in bf16.
_NEG_BIG = -3.0e38


def _round_up(x, m):
    return (x + m - 1) // m * m


def _round_down(x, m):
    return (x // m) * m


def _vmem_capacity_bytes():
    try:
        return int(pltpu.get_tpu_info().vmem_capacity_bytes)
    except Exception:                      # conservative default (v7x: 64 MiB)
        return 64 * 2**20


def _pick_tiles(N, C, HW, itemsize, target_bytes):
    """Choose (b_tile, c_tile) for the lane-dense (b_tile, c_tile, H*W) block."""
    hw_pad = _round_up(HW, 128)                 # lane padding of the block
    # Batch tile: bound the vreg-resident carries (sum + max + one chunk).
    b_tile = max(1, min(N, _MAX_CARRY_ELEMS // max(1, HW)))
    # Channel tile (reduction axis, last in the grid): multiple of 8 so the
    # sublane dim of the block is tile-aligned, or the full C when C < 8.
    if C < 8:
        c_tile = C
    else:
        per_c = b_tile * hw_pad * itemsize      # padded bytes per channel row
        budget_c = _round_down(max(8, target_bytes // per_c), 8)
        c_tile = max(8, min(_round_down(C, 8), budget_c))
    return int(b_tile), int(c_tile)


def _hsa_kernel(x_ref, smat_ref, pmat_ref, osum_ref, omax_ref, *,
                n_channels, width, blocks_per_split, ragged_c, max_dtype):
    # x_ref    : VMEM (b_tile, c_tile, H*W)   lane-dense input slab
    # smat_ref : VMEM (H*W, H) f32            0/1 segment-sum matrix
    # pmat_ref : VMEM (H*W, H) f32            one-hot lane-selection matrix
    # osum_ref : VMEM (b_tile, H) f32         running sum over (C, W)  (output)
    # omax_ref : VMEM (b_tile, H) f32         running max over (C, W)  (output)
    split = pl.program_id(1)
    c_blk = pl.program_id(2)

    b_tile, c_tile, hw = x_ref.shape
    chunk = 8 if c_tile >= 8 else c_tile        # sublane-aligned channel chunk
    n_chunks = c_tile // chunk
    c_base = (split * blocks_per_split + c_blk) * c_tile

    neg = jnp.asarray(_NEG_BIG, dtype=max_dtype)

    def accum_chunk(k, carry):
        s_hw, m_hw = carry
        start = k * chunk
        if not isinstance(start, int):
            start = pl.multiple_of(start, chunk)
        v = x_ref[:, pl.ds(start, chunk), :]                  # (b, chunk, hw)
        if ragged_c:
            # Mask channels >= C in the tail block with neutral elements.
            ch = (jax.lax.broadcasted_iota(jnp.int32, v.shape, 1)
                  + c_base + start)
            valid = ch < n_channels
            v_s = jnp.where(valid, v, jnp.zeros_like(v)).astype(jnp.float32)
            v_m = jnp.where(valid, v, jnp.full_like(v, neg)).astype(max_dtype)
        else:
            v_s = v.astype(jnp.float32)                       # f32 sum path
            v_m = v.astype(max_dtype)                         # bf16-exact max
        # Whole-tile loads + per-chunk sublane reduce: the big 8x chunk never
        # has to live across loop iterations, only the (b_tile, H*W) carries.
        s_hw = s_hw + jnp.sum(v_s, axis=1)
        m_hw = jnp.maximum(m_hw, jnp.max(v_m, axis=1))
        return s_hw, m_hw

    s_hw = jnp.zeros((b_tile, hw), jnp.float32)
    m_hw = jnp.full((b_tile, hw), neg, max_dtype)
    if n_chunks <= 4:
        for k in range(n_chunks):                # short: static unroll
            s_hw, m_hw = accum_chunk(k, (s_hw, m_hw))
    else:                                        # long: in-kernel loop
        s_hw, m_hw = jax.lax.fori_loop(0, n_chunks, accum_chunk, (s_hw, m_hw))

    # --- W-segment reductions, once per grid step -------------------------
    # sum over each length-W lane segment: 0/1 matmul on the (idle) MXU.
    s_h = jnp.dot(s_hw, smat_ref[...],
                  preferred_element_type=jnp.float32,
                  precision=jax.lax.Precision.HIGHEST)        # (b_tile, H)

    # max over each length-W lane segment: log2(W) sliding-window roll+max
    # tree (XLU), then pick lane h*W of every segment with a one-hot matmul.
    m32 = m_hw.astype(jnp.float32)
    span = 1
    while 2 * span <= width:
        m32 = jnp.maximum(m32, pltpu.roll(m32, hw - span, axis=1))
        span *= 2
    if span < width:
        m32 = jnp.maximum(m32, pltpu.roll(m32, hw - (width - span), axis=1))
    m_h = jnp.dot(m32, pmat_ref[...],
                  preferred_element_type=jnp.float32,
                  precision=jax.lax.Precision.HIGHEST)        # (b_tile, H)

    # Accumulate across channel grid blocks directly in the resident output
    # blocks (their index map does not depend on the reduction axis).
    @pl.when(c_blk == 0)
    def _init():
        osum_ref[...] = s_h
        omax_ref[...] = m_h

    @pl.when(c_blk > 0)
    def _accumulate():
        osum_ref[...] = osum_ref[...] + s_h
        omax_ref[...] = jnp.maximum(omax_ref[...], m_h)


def height_spatial_attention(x, conv_weight, *, b_tile=None, c_tile=None):
    """x: (N, C, H, W) f32/bf16; conv_weight: (1, 2, K, K).

    Returns (N, 1, H, 1) float32, matching the PyTorch module.
    """
    N, C, H, W = x.shape
    HW = H * W
    K = conv_weight.shape[-1]
    itemsize = x.dtype.itemsize

    vmem_cap = _vmem_capacity_bytes()
    target = 8 * 2**20 if vmem_cap >= 100 * 2**20 else 4 * 2**20
    auto_b, auto_c = _pick_tiles(N, C, HW, itemsize, target)
    b_tile = auto_b if b_tile is None else int(b_tile)
    c_tile = auto_c if c_tile is None else int(c_tile)

    nb = pl.cdiv(N, b_tile)
    nc = pl.cdiv(C, c_tile)
    # v7x: when the batch axis gives no parallelism, split the channel blocks
    # into two "parallel" halves (combined in the wrapper) so both TensorCores
    # get work.  Harmless on single-core v5e/v6e.
    n_split = 2 if (nb == 1 and nc >= 2 and nc % 2 == 0) else 1
    blocks_per_split = nc // n_split
    ragged_c = (C % c_tile) != 0

    # Lane-dense view: the streamed last axis is H*W, so W never maps to
    # (padded) lanes.  Contiguous reshape -> free.
    x3 = x.reshape(N, C, HW)

    # Segment-sum (0/1) and lane-selection (one-hot) matrices for the
    # in-kernel W-segment reductions.
    hw_ids = jnp.arange(HW, dtype=jnp.int32)
    h_ids = jnp.arange(H, dtype=jnp.int32)
    smat = (hw_ids[:, None] // W == h_ids[None, :]).astype(jnp.float32)
    pmat = (hw_ids[:, None] == h_ids[None, :] * W).astype(jnp.float32)

    max_dtype = jnp.bfloat16 if x.dtype == jnp.bfloat16 else jnp.float32

    # Padding-aware VMEM budget: last two block dims tile to (8 or 16, 128).
    sub = max(8, 32 // itemsize)
    hw_pad = _round_up(HW, 128)
    x_block = b_tile * _round_up(c_tile, sub) * hw_pad * itemsize
    mat_block = _round_up(HW, 8) * _round_up(H, 128) * 4
    out_block = b_tile * 8 * 128 * 4
    vmem_need = 2 * x_block + 4 * mat_block + 4 * out_block
    vmem_limit = int(min(100 * 2**20, max(32 * 2**20, vmem_need + 8 * 2**20)))

    kernel = functools.partial(
        _hsa_kernel, n_channels=C, width=W,
        blocks_per_split=blocks_per_split, ragged_c=ragged_c,
        max_dtype=max_dtype)

    sum_parts, max_parts = pl.pallas_call(
        kernel,
        out_shape=(jax.ShapeDtypeStruct((n_split, N, 1, H), jnp.float32),
                   jax.ShapeDtypeStruct((n_split, N, 1, H), jnp.float32)),
        grid_spec=pltpu.PrefetchScalarGridSpec(
            num_scalar_prefetch=0,
            grid=(nb, n_split, blocks_per_split),   # channel reduction last
            in_specs=[
                pl.BlockSpec((b_tile, c_tile, HW),
                             lambda b, s, c: (b, s * blocks_per_split + c, 0)),
                pl.BlockSpec((HW, H), lambda b, s, c: (0, 0)),   # smat
                pl.BlockSpec((HW, H), lambda b, s, c: (0, 0)),   # pmat
            ],
            out_specs=(
                pl.BlockSpec((None, b_tile, None, H),
                             lambda b, s, c: (s, b, 0, 0)),
                pl.BlockSpec((None, b_tile, None, H),
                             lambda b, s, c: (s, b, 0, 0)),
            ),
        ),
        compiler_params=pltpu.CompilerParams(
            dimension_semantics=("parallel", "parallel", "arbitrary"),
            vmem_limit_bytes=vmem_limit,
        ),
        cost_estimate=pl.CostEstimate(
            flops=int(2 * N * C * HW + 4 * N * nc * HW * H),
            transcendentals=0,
            bytes_accessed=int(x.size * itemsize + 2 * HW * H * 4
                               + 2 * n_split * N * H * 4),
        ),
    )(x3, smat, pmat)

    # Trivial cross-split combine (only 2 tiny (N, H) slabs when splitting).
    total_sum = jnp.sum(sum_parts, axis=0)[:, 0, :]          # (N, H) f32
    total_max = jnp.max(max_parts, axis=0)[:, 0, :]          # (N, H) f32
    avg = total_sum * (1.0 / float(C * W))

    # 7-tap conv along H (only the central column of the KxK kernel touches
    # the width-1 conv input) + sigmoid.  O(N*H*K) work, done in plain XLA
    # per the review (removes the in-kernel finalize entirely).
    w_eff = conv_weight[0, :, :, K // 2].astype(jnp.float32)  # (2, K)
    pad = K // 2
    avg_p = jnp.pad(avg, ((0, 0), (pad, pad)))
    max_p = jnp.pad(total_max, ((0, 0), (pad, pad)))
    y = jnp.zeros((N, H), jnp.float32)
    for k in range(K):
        y = y + w_eff[0, k] * avg_p[:, k:k + H] + w_eff[1, k] * max_p[:, k:k + H]
    return jax.nn.sigmoid(y).reshape(N, 1, H, 1)


def _reference(x, conv_weight):
    # Pure-JAX reference mirroring the PyTorch forward.
    avg_out = jnp.mean(x, axis=(1, 3), keepdims=True)            # (N,1,H,1)
    max_out = jnp.max(x, axis=1, keepdims=True)                  # (N,1,H,W)
    max_out = jnp.max(max_out, axis=3, keepdims=True)            # (N,1,H,1)
    cat = jnp.concatenate([avg_out, max_out], axis=1)            # (N,2,H,1)
    k = conv_weight.shape[-1]
    y = jax.lax.conv_general_dilated(
        cat, conv_weight, window_strides=(1, 1),
        padding=((k // 2, k // 2), (k // 2, k // 2)),
        dimension_numbers=("NCHW", "OIHW", "NCHW"))
    return jax.nn.sigmoid(y)


if __name__ == "__main__":
    key = jax.random.PRNGKey(0)
    kx, kw, k2, k3 = jax.random.split(key, 4)

    # Conv2d(2, 1, kernel_size=7, bias=False) weight: (out=1, in=2, 7, 7)
    conv_weight = (jax.random.normal(
        kw, (1, 2, KERNEL_SIZE, KERNEL_SIZE), dtype=jnp.float32) * 0.1)

    # 1) float32 main path.
    x = jax.random.normal(kx, (2, 4, 16, 16), dtype=jnp.float32)
    out = jax.block_until_ready(height_spatial_attention(x, conv_weight))
    ref = _reference(x, conv_weight)
    assert out.shape == (2, 1, 16, 1)
    assert jnp.allclose(out, ref, atol=1e-5, rtol=1e-5)

    # 2) bf16 input (f32 sum accumulation, bf16 running max in-kernel).
    out_bf16 = jax.block_until_ready(
        height_spatial_attention(x.astype(jnp.bfloat16), conv_weight))
    ref_bf16 = _reference(x.astype(jnp.bfloat16).astype(jnp.float32),
                          conv_weight)
    assert jnp.allclose(out_bf16, ref_bf16, atol=2e-2, rtol=2e-2)

    # 3) Ragged batch block (N % b_tile != 0): relies on Pallas edge masking.
    x3 = jax.random.normal(k2, (3, 4, 8, 16), dtype=jnp.float32)
    out3 = jax.block_until_ready(
        height_spatial_attention(x3, conv_weight, b_tile=2))
    assert jnp.allclose(out3, _reference(x3, conv_weight), atol=1e-5, rtol=1e-5)

    # 4) Ragged channel block + 2-way parallel channel split
    #    (C=12 -> c_tile=8, nb=1 -> n_split=2, masked tail channels).
    x4 = jax.random.normal(k3, (2, 12, 8, 16), dtype=jnp.float32)
    out4 = jax.block_until_ready(height_spatial_attention(x4, conv_weight))
    assert jnp.allclose(out4, _reference(x4, conv_weight), atol=1e-5, rtol=1e-5)

    print("KERNEL_OK")
</pallas_src>

<mosaic_0001>
module attributes {stable_mosaic.version = 11 : i64} {
  func.func @_hsa_kernel(%arg0: i32, %arg1: i32, %arg2: i32, %arg3: memref<2x4x256xf32, #tpu.memory_space<vmem>>, %arg4: memref<256x16xf32, #tpu.memory_space<vmem>>, %arg5: memref<256x16xf32, #tpu.memory_space<vmem>>, %arg6: memref<1x2x1x16xf32, #tpu.memory_space<vmem>>, %arg7: memref<1x2x1x16xf32, #tpu.memory_space<vmem>>) attributes {dimension_semantics = [#tpu.dimension_semantics<parallel>, #tpu.dimension_semantics<parallel>, #tpu.dimension_semantics<arbitrary>], iteration_bounds = array<i64: 1, 1, 1>, scalar_prefetch = 0 : i64, scratch_operands = 0 : i64, tpu.core_type = #tpu.core_type<tc>, window_params = [{transform_indices = @transform_0, window_bounds = array<i64: 2, 4, 256>}, {pipeline_mode = #tpu.pipeline_mode<synchronous>, transform_indices = @transform_1, window_bounds = array<i64: 256, 16>}, {pipeline_mode = #tpu.pipeline_mode<synchronous>, transform_indices = @transform_2, window_bounds = array<i64: 256, 16>}, {transform_indices = @transform_3, window_bounds = array<i64: 1, 2, 1, 16>}, {transform_indices = @transform_4, window_bounds = array<i64: 1, 2, 1, 16>}]} {
    %cst = arith.constant 0.000000e+00 : f32
    %0 = vector.broadcast %cst : f32 to vector<2x256xf32>
    %cst_0 = arith.constant -3.000000e+38 : f32
    %1 = vector.broadcast %cst_0 : f32 to vector<2x256xf32>
    %c0 = arith.constant 0 : index
    %c0_1 = arith.constant 0 : index
    %c0_2 = arith.constant 0 : index
    %2 = vector.load %arg3[%c0, %c0_1, %c0_2] : memref<2x4x256xf32, #tpu.memory_space<vmem>>, vector<2x4x256xf32>
    %cst_3 = arith.constant dense<0.000000e+00> : vector<2x256xf32>
    %3 = vector.multi_reduction <add>, %2, %cst_3 [1] : vector<2x4x256xf32> to vector<2x256xf32>
    %4 = arith.addf %0, %3 : vector<2x256xf32>
    %cst_4 = arith.constant dense<0xFF800000> : vector<2x256xf32>
    %5 = vector.multi_reduction <maximumf>, %2, %cst_4 [1] : vector<2x4x256xf32> to vector<2x256xf32>
    %6 = arith.maximumf %1, %5 : vector<2x256xf32>
    %c0_5 = arith.constant 0 : index
    %c0_6 = arith.constant 0 : index
    %7 = vector.load %arg4[%c0_5, %c0_6] : memref<256x16xf32, #tpu.memory_space<vmem>>, vector<256x16xf32>
    %cst_7 = arith.constant dense<0.000000e+00> : vector<2x16xf32>
    %8 = tpu.matmul %4, %7, %cst_7 {dimension_numbers = #tpu.dot_dimension_numbers<[1], [0], [0], [1], [0, 0, 1, 1], [], []>, precision = #tpu.contract_precision<fp32>} : vector<2x256xf32>, vector<256x16xf32>, vector<2x16xf32> -> vector<2x16xf32>
    %c255_i32 = arith.constant 255 : i32
    %9 = tpu.dynamic_rotate %6 by %c255_i32 dim 1 : vector<2x256xf32>, i32 -> vector<2x256xf32>
    %10 = arith.maximumf %6, %9 : vector<2x256xf32>
    %c254_i32 = arith.constant 254 : i32
    %11 = tpu.dynamic_rotate %10 by %c254_i32 dim 1 : vector<2x256xf32>, i32 -> vector<2x256xf32>
    %12 = arith.maximumf %10, %11 : vector<2x256xf32>
    %c252_i32 = arith.constant 252 : i32
    %13 = tpu.dynamic_rotate %12 by %c252_i32 dim 1 : vector<2x256xf32>, i32 -> vector<2x256xf32>
    %14 = arith.maximumf %12, %13 : vector<2x256xf32>
    %c248_i32 = arith.constant 248 : i32
    %15 = tpu.dynamic_rotate %14 by %c248_i32 dim 1 : vector<2x256xf32>, i32 -> vector<2x256xf32>
    %16 = arith.maximumf %14, %15 : vector<2x256xf32>
    %c0_8 = arith.constant 0 : index
    %c0_9 = arith.constant 0 : index
    %17 = vector.load %arg5[%c0_8, %c0_9] : memref<256x16xf32, #tpu.memory_space<vmem>>, vector<256x16xf32>
    %cst_10 = arith.constant dense<0.000000e+00> : vector<2x16xf32>
    %18 = tpu.matmul %16, %17, %cst_10 {dimension_numbers = #tpu.dot_dimension_numbers<[1], [0], [0], [1], [0, 0, 1, 1], [], []>, precision = #tpu.contract_precision<fp32>} : vector<2x256xf32>, vector<256x16xf32>, vector<2x16xf32> -> vector<2x16xf32>
    %c0_i32 = arith.constant 0 : i32
    %19 = arith.cmpi eq, %arg2, %c0_i32 : i32
    %20 = arith.extui %19 : i1 to i32
    %c0_i32_11 = arith.constant 0 : i32
    %21 = arith.cmpi ne, %20, %c0_i32_11 : i32
    scf.if %21 {
      %c0_14 = arith.constant 0 : index
      %c0_15 = arith.constant 0 : index
      %c0_16 = arith.constant 0 : index
      %c0_17 = arith.constant 0 : index
      %25 = vector.load %arg6[%c0_14, %c0_15, %c0_16, %c0_17] : memref<1x2x1x16xf32, #tpu.memory_space<vmem>>, vector<1x2x1x16xf32>
      %26 = vector.shape_cast %25 : vector<1x2x1x16xf32> to vector<2x16xf32>
      %27 = vector.shape_cast %8 : vector<2x16xf32> to vector<1x2x1x16xf32>
      tpu.vector_store %arg6[%c0_14, %c0_15, %c0_16, %c0_17], %27 {strides = array<i32>} : memref<1x2x1x16xf32, #tpu.memory_space<vmem>>, vector<1x2x1x16xf32>,
      %c0_18 = arith.constant 0 : index
      %c0_19 = arith.constant 0 : index
      %c0_20 = arith.constant 0 : index
      %c0_21 = arith.constant 0 : index
      %28 = vector.load %arg7[%c0_18, %c0_19, %c0_20, %c0_21] : memref<1x2x1x16xf32, #tpu.memory_space<vmem>>, vector<1x2x1x16xf32>
      %29 = vector.shape_cast %28 : vector<1x2x1x16xf32> to vector<2x16xf32>
      %30 = vector.shape_cast %18 : vector<2x16xf32> to vector<1x2x1x16xf32>
      tpu.vector_store %arg7[%c0_18, %c0_19, %c0_20, %c0_21], %30 {strides = array<i32>} : memref<1x2x1x16xf32, #tpu.memory_space<vmem>>, vector<1x2x1x16xf32>,
    } else {
    }
    %c0_i32_12 = arith.constant 0 : i32
    %22 = arith.cmpi sgt, %arg2, %c0_i32_12 : i32
    %23 = arith.extui %22 : i1 to i32
    %c0_i32_13 = arith.constant 0 : i32
    %24 = arith.cmpi ne, %23, %c0_i32_13 : i32
    scf.if %24 {
      %c0_14 = arith.constant 0 : index
      %c0_15 = arith.constant 0 : index
      %c0_16 = arith.constant 0 : index
      %c0_17 = arith.constant 0 : index
      %25 = vector.load %arg6[%c0_14, %c0_15, %c0_16, %c0_17] : memref<1x2x1x16xf32, #tpu.memory_space<vmem>>, vector<1x2x1x16xf32>
      %26 = vector.shape_cast %25 : vector<1x2x1x16xf32> to vector<2x16xf32>
      %27 = arith.addf %26, %8 : vector<2x16xf32>
      %c0_18 = arith.constant 0 : index
      %c0_19 = arith.constant 0 : index
      %c0_20 = arith.constant 0 : index
      %c0_21 = arith.constant 0 : index
      %28 = vector.load %arg6[%c0_18, %c0_19, %c0_20, %c0_21] : memref<1x2x1x16xf32, #tpu.memory_space<vmem>>, vector<1x2x1x16xf32>
      %29 = vector.shape_cast %28 : vector<1x2x1x16xf32> to vector<2x16xf32>
      %30 = vector.shape_cast %27 : vector<2x16xf32> to vector<1x2x1x16xf32>
      tpu.vector_store %arg6[%c0_18, %c0_19, %c0_20, %c0_21], %30 {strides = array<i32>} : memref<1x2x1x16xf32, #tpu.memory_space<vmem>>, vector<1x2x1x16xf32>,
      %c0_22 = arith.constant 0 : index
      %c0_23 = arith.constant 0 : index
      %c0_24 = arith.constant 0 : index
      %c0_25 = arith.constant 0 : index
      %31 = vector.load %arg7[%c0_22, %c0_23, %c0_24, %c0_25] : memref<1x2x1x16xf32, #tpu.memory_space<vmem>>, vector<1x2x1x16xf32>
      %32 = vector.shape_cast %31 : vector<1x2x1x16xf32> to vector<2x16xf32>
      %33 = arith.maximumf %32, %18 : vector<2x16xf32>
      %c0_26 = arith.constant 0 : index
      %c0_27 = arith.constant 0 : index
      %c0_28 = arith.constant 0 : index
      %c0_29 = arith.constant 0 : index
      %34 = vector.load %arg7[%c0_26, %c0_27, %c0_28, %c0_29] : memref<1x2x1x16xf32, #tpu.memory_space<vmem>>, vector<1x2x1x16xf32>
      %35 = vector.shape_cast %34 : vector<1x2x1x16xf32> to vector<2x16xf32>
      %36 = vector.shape_cast %33 : vector<2x16xf32> to vector<1x2x1x16xf32>
      tpu.vector_store %arg7[%c0_26, %c0_27, %c0_28, %c0_29], %36 {strides = array<i32>} : memref<1x2x1x16xf32, #tpu.memory_space<vmem>>, vector<1x2x1x16xf32>,
    } else {
    }
    return
  }
  func.func @transform_0(%arg0: i32, %arg1: i32, %arg2: i32) -> (i32, i32, i32) {
    %c1_i32 = arith.constant 1 : i32
    %0 = arith.muli %arg1, %c1_i32 : i32
    %1 = arith.addi %0, %arg2 : i32
    %c0_i32 = arith.constant 0 : i32
    %c0_i32_0 = arith.constant 0 : i32
    return %arg0, %1, %c0_i32 : i32, i32, i32
  }
  func.func @transform_1(%arg0: i32, %arg1: i32, %arg2: i32) -> (i32, i32) {
    %c0_i32 = arith.constant 0 : i32
    %c0_i32_0 = arith.constant 0 : i32
    %c0_i32_1 = arith.constant 0 : i32
    return %c0_i32, %c0_i32_0 : i32, i32
  }
  func.func @transform_2(%arg0: i32, %arg1: i32, %arg2: i32) -> (i32, i32) {
    %c0_i32 = arith.constant 0 : i32
    %c0_i32_0 = arith.constant 0 : i32
    %c0_i32_1 = arith.constant 0 : i32
    return %c0_i32, %c0_i32_0 : i32, i32
  }
  func.func @transform_3(%arg0: i32, %arg1: i32, %arg2: i32) -> (i32, i32, i32, i32) {
    %c0_i32 = arith.constant 0 : i32
    %c0_i32_0 = arith.constant 0 : i32
    %c0_i32_1 = arith.constant 0 : i32
    return %arg1, %arg0, %c0_i32, %c0_i32_0 : i32, i32, i32, i32
  }
  func.func @transform_4(%arg0: i32, %arg1: i32, %arg2: i32) -> (i32, i32, i32, i32) {
    %c0_i32 = arith.constant 0 : i32
    %c0_i32_0 = arith.constant 0 : i32
    %c0_i32_1 = arith.constant 0 : i32
    return %arg1, %arg0, %c0_i32, %c0_i32_0 : i32, i32, i32, i32
  }
}

</mosaic_0001>

<bundles_post_ra>
// kernel: tpu_custom_call.1
= control target key start
LH: loop header
LB: loop body
LE: loop exit
PB: predicated region body
PF: predicated region fallthrough
CT: control target
= control target key end

     0   :  { %10 = vsyncpa [#allocation3], 0  ;;  %s3173_s0 = inlined_call_operand.vmem [shape: f32[2,4,256], index: 0, kind: input, shape index: {}]   ;;  %s3174_s1 = inlined_call_operand.vmem [shape: f32[256,16], index: 1, kind: input, shape index: {}]   ;;  %s3175_s2 = inlined_call_operand.vmem [shape: f32[256,16], index: 2, kind: input, shape index: {}]   ;;  %s3176_s3 = inlined_call_operand.hbm [shape: f32[1,2,1,16], index: 3, kind: output, shape index: {0}]   ;;  %s3177_s4 = inlined_call_operand.hbm [shape: f32[1,2,1,16], index: 4, kind: output, shape index: {1}]  }
   0x1   :  { %v38_v0 = vld [vmem:[%s3173_s0] sm:$0xff]  ;;  %v39_v1 = vld [vmem:[%s3173_s0 + $0x8] sm:$0xff] }
   0x2   :  { %42 = vst [vmem:[#allocation1] ss:$2 sm:$0xff] %v38_v0 }
   0x3   :  { %11 = vsyncpa [#allocation5], 0  ;;  %46 = vst [vmem:[#allocation1 + $0x10] ss:$2 sm:$0xff] %v39_v1  ;;  %vm53_vm0 = vcmask 1043456   ;;  %vm165_vm1 = vcmask 1041409   ;;  %v864_v44 = vlaneseq }
   0x4   :  { %s1832_s0 = smov 127   ;;  %s1833_s19 = smov 126   ;;  %v144_v60 = vld [vmem:[%s3174_s1 + $0x78] sm:$0xff]  ;;  %v143_v61 = vld [vmem:[%s3174_s1 + $0x70] sm:$0xff]  ;;  %v142_v62 = vld [vmem:[%s3174_s1 + $0x68] sm:$0xff]  ;;  %vm1699_vm6 = vcmask 122880  }
   0x5   :  { %v1885_v46 = vand.u32 127, %v864_v44  ;;  %v1911_v63 = vand.u32 4294901760, %v144_v60  ;;  %s1736_s16 = sshll.u32 %s3176_s3, 4  ;;  %s1837_s17 = smov 16   ;;  %s1737_s16 = int_to_ptr.hbm [resolvable:$true] %s1736_s16 }
   0x6   :  { %s1838_s18 = smov 1   ;;  %s1839_s3 = smov [#allocation4]  }
   0x7   :  { %vm866_vm2 = vcmp.lt.s32.totalorder %v1885_v46, 127  ;;  %171 = vmatpush.msra.mxu0 %v1911_v63  ;;  %367 = vmatpush.msra.mxu3 %v1911_v63  ;;  %vm895_vm3 = vcmp.lt.s32.totalorder %v1885_v46, 126  ;;  %vm924_vm4 = vcmp.lt.s32.totalorder %v1885_v46, 124  ;;  %vm953_vm5 = vcmp.lt.s32.totalorder %v1885_v46, 120  ;;  %s1749_s21 = sshll.u32 %s3177_s4, 4  ;;  %s1750_s21 = int_to_ptr.hbm [resolvable:$true] %s1749_s21 }
   0x9   :  { %v1871_v2 = vld.sshfl [vmem:[#allocation1] sm:$0xff pattern:$0x75316420]  ;;  %v1873_v3 = vld.sshfl [vmem:[#allocation1 + $0x8] sm:$0xff pattern:$0x75316420] }
   0xa   :  { %v1875_v4 = vld.sshfl [vmem:[#allocation1 + $0x10] sm:$0xff pattern:$0x75316420]  ;;  %v1877_v5 = vld.sshfl [vmem:[#allocation1 + $0x18] sm:$0xff pattern:$0x75316420] }
   0xb   :  { %86 = vst [vmem:[#allocation1] ss:$2 sm:$0xff] %v38_v0  ;;  %v1913_v0 = vand.u32 4294901760, %v143_v61 }
   0xc   :  { %90 = vst [vmem:[#allocation1 + $0x10] ss:$2 sm:$0xff] %v39_v1  ;;  %v1915_v1 = vand.u32 4294901760, %v142_v62 }
   0xd   :  { %173 = vmatpush.msra.mxu0 %v1913_v0  ;;  %369 = vmatpush.msra.mxu3 %v1913_v0 }
   0xf   :  { %175 = vmatpush.msra.mxu0 %v1915_v1  ;;  %371 = vmatpush.msra.mxu3 %v1915_v1 }
  0x12   :  { %v87_v6 = vld.sshfl [vmem:[#allocation1] sm:$0xff pattern:$0x75316420]  ;;  %v88_v7 = vld.sshfl [vmem:[#allocation1 + $0x8] sm:$0xff pattern:$0x75316420] }
  0x13   :  { %v91_v8 = vld.sshfl [vmem:[#allocation1 + $0x10] sm:$0xff pattern:$0x75316420]  ;;  %v97_v9 = vsel %vm53_vm0, %v87_v6, -inf  ;;  %v104_v10 = vsel %vm53_vm0, %v88_v7, -inf  ;;  %v141_v6 = vld [vmem:[%s3174_s1 + $0x60] sm:$0xff] }
  0x14   :  { %v98_v11 = vrot.slane %v97_v9, 4  ;;  %v111_v12 = vsel %vm53_vm0, %v91_v8, -inf  ;;  %v92_v13 = vld.sshfl [vmem:[#allocation1 + $0x18] sm:$0xff pattern:$0x75316420]  ;;  %v105_v14 = vrot.slane %v104_v10, 4 }
  0x15   :  { %v112_v15 = vrot.slane %v111_v12, 4  ;;  %v118_v16 = vsel %vm53_vm0, %v92_v13, -inf  ;;  %v140_v7 = vld [vmem:[%s3174_s1 + $0x58] sm:$0xff]  ;;  %v139_v8 = vld [vmem:[%s3174_s1 + $0x50] sm:$0xff]  ;;  %v137_v13 = vld [vmem:[%s3174_s1 + $0x40] sm:$0xff] }
  0x16   :  { %v99_v17 = vmax.f32 %v97_v9, %v98_v11  ;;  %v106_v18 = vmax.f32 %v104_v10, %v105_v14  ;;  %v119_v19 = vrot.slane %v118_v16, 4  ;;  %v1926_v9 = vand.u32 4294901760, %v141_v6 }
  0x17   :  { %v113_v20 = vmax.f32 %v111_v12, %v112_v15  ;;  %v1928_v10 = vand.u32 4294901760, %v140_v7  ;;  %v1930_v11 = vand.u32 4294901760, %v139_v8  ;;  %v138_v12 = vld [vmem:[%s3174_s1 + $0x48] sm:$0xff]  ;;  %v1939_v14 = vsub.f32 %v144_v60, %v1911_v63 }
  0x18   :  { %v100_v21 = vrot.slane %v99_v17, 2  ;;  %v107_v22 = vrot.slane %v106_v18, 2  ;;  %v120_v23 = vmax.f32 %v118_v16, %v119_v19  ;;  %v1943_v15 = vsub.f32 %v143_v61, %v1913_v0  ;;  %177 = vmatpush.msra.mxu0 %v1926_v9  ;;  %373 = vmatpush.msra.mxu3 %v1926_v9 }
  0x19   :  { %v114_v24 = vrot.slane %v113_v20, 2  ;;  %v1947_v16 = vsub.f32 %v142_v62, %v1915_v1  ;;  %v1955_v19 = vsub.f32 %v140_v7, %v1928_v10  ;;  %314 = vmatpush.msra.mxu2 %v1939_v14 }
  0x1a   :  { %v101_v25 = vmax.f32 %v99_v17, %v100_v21  ;;  %v108_v26 = vmax.f32 %v106_v18, %v107_v22  ;;  %v121_v27 = vrot.slane %v120_v23, 2  ;;  %v1949_v17 = vand.u32 4294901760, %v138_v12  ;;  %179 = vmatpush.msra.mxu0 %v1928_v10  ;;  %375 = vmatpush.msra.mxu3 %v1928_v10 }
  0x1b   :  { %v115_v28 = vmax.f32 %v113_v20, %v114_v24  ;;  %v1952_v18 = vsub.f32 %v141_v6, %v1926_v9  ;;  %v1958_v20 = vsub.f32 %v139_v8, %v1930_v11  ;;  %v213_v21 = vand.u32 4294901760, %v1939_v14  ;;  %317 = vmatpush.msra.mxu2 %v1943_v15 }
  0x1c   :  { %v102_v29 = vrot.slane %v101_v25, 1  ;;  %v122_v30 = vmax.f32 %v120_v23, %v121_v27  ;;  %v109_v32 = vrot.slane %v108_v26, 1  ;;  %v219_v22 = vand.u32 4294901760, %v1943_v15  ;;  %181 = vmatpush.msra.mxu0 %v1930_v11  ;;  %377 = vmatpush.msra.mxu3 %v1930_v11 }
  0x1d   :  { %v116_v31 = vrot.slane %v115_v28, 1  ;;  %v225_v23 = vand.u32 4294901760, %v1947_v16  ;;  %v1965_v24 = vand.u32 4294901760, %v137_v13  ;;  %v237_v27 = vand.u32 4294901760, %v1955_v19  ;;  %320 = vmatpush.msra.mxu2 %v1947_v16 }
  0x1e   :  { %v103_v33 = vmax.f32 %v101_v25, %v102_v29  ;;  %v123_v34 = vrot.slane %v122_v30, 1  ;;  %v110_v38 = vmax.f32 %v108_v26, %v109_v32  ;;  %v136_v25 = vld [vmem:[%s3174_s1 + $0x38] sm:$0xff]  ;;  %v231_v26 = vand.u32 4294901760, %v1952_v18  ;;  %183 = vmatpush.msra.mxu0 %v1949_v17  ;;  %379 = vmatpush.msra.mxu3 %v1949_v17 }
  0x1f   :  { %v117_v35 = vmax.f32 %v115_v28, %v116_v31  ;;  %v1974_v28 = vsub.f32 %v138_v12, %v1949_v17  ;;  %v220_v31 = vsub.f32 %v1943_v15, %v219_v22  ;;  %v226_v32 = vsub.f32 %v1947_v16, %v225_v23  ;;  %323 = vmatpush.msra.mxu2 %v1952_v18 }
  0x20   :  { %v125_v36 = vmax.f32 %v103_v33, -3e+38  ;;  %v124_v39 = vmax.f32 %v122_v30, %v123_v34  ;;  %v126_v41 = vmax.f32 %v110_v38, -3e+38  ;;  %v214_v30 = vsub.f32 %v1939_v14, %v213_v21  ;;  %185 = vmatpush.msra.mxu0 %v1965_v24  ;;  %381 = vmatpush.msra.mxu3 %v1965_v24 }
  0x21   :  { %v127_v37 = vmax.f32 %v117_v35, -3e+38  ;;  %v243_v33 = vand.u32 4294901760, %v1958_v20  ;;  %v1989_v34 = vand.u32 4294901760, %v136_v25  ;;  %v135_v35 = vld [vmem:[%s3174_s1 + $0x30] sm:$0xff]  ;;  %v221_v38 = vand.u32 4294901760, %v220_v31  ;;  %326 = vmatpush.msra.mxu2 %v1955_v19 }
  0x22   :  { %v128_v42 = vmax.f32 %v124_v39, -3e+38  ;;  %v232_v39 = vsub.f32 %v1952_v18, %v231_v26  ;;  %v152_v18 = vld [vmem:[%s3174_s1 + $0xb8] sm:$0xff] }
  0x23   :  { %v856_v40 = vsel %vm165_vm1, %v127_v37, %v125_v36  ;;  %v2012_v44 = vsub.f32 %v136_v25, %v1989_v34  ;;  %329 = vmatpush.msra.mxu2 %v1958_v20  ;;  %187 = vmatpush.msra.mxu0 %v1989_v34 }
  0x24   :  { %860 = vrot.lane.b32.xlu0 %v856_v40, %s1832_s0  ;;  %v857_v43 = vsel %vm165_vm1, %v128_v42, %v126_v41  ;;  %v2003_v40 = vsub.f32 %v137_v13, %v1965_v24  ;;  %v133_v13 = vld [vmem:[%s3174_s1 + $0x20] sm:$0xff]  ;;  %383 = vmatpush.msra.mxu3 %v1989_v34 }
  0x25   :  { %332 = vmatpush.msra.mxu2 %v1974_v28 }
  0x27   :  { %335 = vmatpush.msra.mxu2 %v2003_v40 }
  0x29   :  { %338 = vmatpush.msra.mxu2 %v2012_v44 }
  0x2c   :  { %862 = vrot.lane.b32.xlu0 %v857_v43, %s1832_s0  ;;  %v227_v43 = vand.u32 4294901760, %v226_v32  ;;  %s1747_s0 = sshll.u32 %s1839_s3, 4  ;;  %s1748_s0 = int_to_ptr.vmem [resolvable:$true] %s1747_s0 }
  0x96   :  { %v861_v45 = vpop.permute.xlu0 %860 }
  0x9e   :  { %v863_v47 = vpop.permute.xlu0 %862 }
  0x9f   :  { %v867_v48 = vsel %vm866_vm2, %v861_v45, %v863_v47  ;;  %v868_v49 = vsel %vm866_vm2, %v863_v47, %v861_v45  ;;  %v2014_v45 = vand.u32 4294901760, %v135_v35 }
  0xa0   :  { %v871_v50 = vrot.slane %v867_v48, 1  ;;  %v872_v51 = vrot.slane %v868_v49, 1  ;;  %v1890_v53 = vmax.f32 %v125_v36, %v867_v48  ;;  %v1898_v58 = vmax.f32 %v126_v41, %v868_v49  ;;  %v134_v36 = vld [vmem:[%s3174_s1 + $0x28] sm:$0xff] }
  0xa1   :  { %v238_v41 = vsub.f32 %v1955_v19, %v237_v27  ;;  %v2016_v47 = vand.u32 4294901760, %v134_v36  ;;  %v233_v48 = vand.u32 4294901760, %v232_v39  ;;  %v244_v49 = vsub.f32 %v1958_v20, %v243_v33  ;;  %189 = vmatpush.msra.mxu0 %v2014_v45  ;;  %385 = vmatpush.msra.mxu3 %v2014_v45  ;;  %v151_v19 = vld [vmem:[%s3174_s1 + $0xb0] sm:$0xff]  ;;  %v148_v20 = vld [vmem:[%s3174_s1 + $0x98] sm:$0xff] }
  0xa2   :  { %v1888_v52 = vmax.f32 %v127_v37, %v871_v50  ;;  %v1893_v55 = vmax.f32 %v128_v42, %v872_v51  ;;  %v215_v37 = vand.u32 4294901760, %v214_v30  ;;  %v3189_v42 = vand.u32 4294901760, %v1974_v28 }
  0xa3   :  { %v3185_v50 = vand.u32 4294901760, %v2003_v40  ;;  %v2027_v51 = vsub.f32 %v135_v35, %v2014_v45  ;;  %v2037_v60 = vsub.f32 %v134_v36, %v2016_v47  ;;  %v245_v7 = vand.u32 4294901760, %v244_v49  ;;  %v132_v35 = vld [vmem:[%s3174_s1 + $0x18] sm:$0xff]  ;;  %191 = vmatpush.msra.mxu0 %v2016_v47  ;;  %387 = vmatpush.msra.mxu3 %v2016_v47 }
  0xa4   :  { %v885_v54 = vrot.slane %v1888_v52, 7  ;;  %v887_v57 = vrot.slane %v1893_v55, 7  ;;  %216 = vmatpush.msra.mxu1 %v215_v37  ;;  %v2068_v36 = vand.u32 4294901760, %v133_v13 }
  0xa5   :  { %v256_v8 = vsub.f32 %v2003_v40, %v3185_v50  ;;  %v3182_v12 = vand.u32 4294901760, %v2027_v51  ;;  %v3180_v32 = vand.u32 4294901760, %v2037_v60  ;;  %341 = vmatpush.msra.mxu2 %v2027_v51 }
  0xa6   :  { %v886_v56 = vsel %vm165_vm1, %v885_v54, %v1890_v53  ;;  %v888_v59 = vsel %vm165_vm1, %v887_v57, %v1898_v58  ;;  %222 = vmatpush.msra.mxu1 %v221_v38  ;;  %v250_v54 = vsub.f32 %v1974_v28, %v3189_v42  ;;  %v239_v57 = vand.u32 4294901760, %v238_v41  ;;  %193 = vmatpush.msra.mxu0 %v2068_v36 }
  0xa7   :  { %891 = vrot.lane.b32.xlu1 %v886_v56, %s1833_s19  ;;  %v257_v38 = vand.u32 4294901760, %v256_v8  ;;  %v268_v39 = vsub.f32 %v2027_v51, %v3182_v12  ;;  %v2080_v41 = vand.u32 4294901760, %v132_v35  ;;  %v274_v49 = vsub.f32 %v2037_v60, %v3180_v32  ;;  %344 = vmatpush.msra.mxu2 %v2037_v60  ;;  %v131_v8 = vld [vmem:[%s3174_s1 + $0x10] sm:$0xff] }
  0xa8   :  { %228 = vmatpush.msra.mxu1 %v227_v43  ;;  %v251_v25 = vand.u32 4294901760, %v250_v54  ;;  %v2094_v54 = vsub.f32 %v133_v13, %v2068_v36  ;;  %389 = vmatpush.msra.mxu3 %v2068_v36 }
  0xa9   :  { %195 = vmatpush.msra.mxu0 %v2080_v41 }
  0xaa   :  { %234 = vmatpush.msra.mxu1 %v233_v48  ;;  %347 = vmatpush.msra.mxu2 %v2094_v54  ;;  %v3179_v13 = vand.u32 4294901760, %v2094_v54 }
  0xab   :  { %391 = vmatpush.msra.mxu3 %v2080_v41 }
  0xac   :  { %240 = vmatpush.msra.mxu1 %v239_v57  ;;  %v275_v57 = vand.u32 4294901760, %v274_v49 }
  0xae   :  { %246 = vmatpush.msra.mxu1 %v245_v7 }
  0xaf   :  { %893 = vrot.lane.b32.xlu1 %v888_v59, %s1833_s19  ;;  %v3183_v59 = vand.u32 4294901760, %v2012_v44  ;;  %s1834_s19 = smov 124  }
  0xb0   :  { %252 = vmatpush.msra.mxu1 %v251_v25  ;;  %v2116_v25 = vand.u32 4294901760, %v131_v8 }
  0xb1   :  { %v262_v31 = vsub.f32 %v2012_v44, %v3183_v59 }
  0xb2   :  { %258 = vmatpush.msra.mxu1 %v257_v38  ;;  %197 = vmatpush.msra.mxu0 %v2116_v25  ;;  %v129_v38 = vld [vmem:[%s3174_s1] sm:$0xff] }
  0xb3   :  { %v263_v48 = vand.u32 4294901760, %v262_v31  ;;  %393 = vmatpush.msra.mxu3 %v2116_v25 }
  0xb5   :  { %264 = vmatpush.msra.mxu1 %v263_v48 }
 0x119   :  { %v892_v29 = vpop.permute.xlu1 %891 }
 0x121   :  { %v894_v56 = vpop.permute.xlu1 %893 }
 0x122   :  { %v896_v61 = vsel %vm895_vm3, %v892_v29, %v894_v56  ;;  %v897_v62 = vsel %vm895_vm3, %v894_v56, %v892_v29 }
 0x123   :  { %v900_v6 = vrot.slane %v896_v61, 1  ;;  %v901_v29 = vrot.slane %v897_v62, 1 }
 0x125   :  { %v2056_v30 = vmax.f32 %v1888_v52, %v900_v6  ;;  %v2071_v52 = vmax.f32 %v1890_v53, %v896_v61  ;;  %v2083_v43 = vmax.f32 %v1893_v55, %v901_v29  ;;  %v269_v55 = vand.u32 4294901760, %v268_v39 }
 0x126   :  { %v2101_v61 = vsub.f32 %v132_v35, %v2080_v41  ;;  %v2106_v6 = vmax.f32 %v1898_v58, %v897_v62  ;;  %v130_v58 = vld [vmem:[%s3174_s1 + $0x8] sm:$0xff]  ;;  %v280_v62 = vsub.f32 %v2094_v54, %v3179_v13  ;;  %v2125_v29 = vsub.f32 %v131_v8, %v2116_v25 }
 0x127   :  { %v914_v37 = vrot.slane %v2056_v30, 7  ;;  %v916_v56 = vrot.slane %v2083_v43, 7  ;;  %270 = vmatpush.msra.mxu1 %v269_v55  ;;  %v2129_v35 = vand.u32 4294901760, %v130_v58  ;;  %v158_v13 = vld [vmem:[%s3174_s1 + $0xe8] sm:$0xff] }
 0x128   :  { %350 = vmatpush.msra.mxu2 %v2101_v61  ;;  %v3178_v31 = vand.u32 4294901760, %v2101_v61  ;;  %v3181_v55 = vand.u32 4294901760, %v2125_v29 }
 0x129   :  { %v915_v53 = vsel %vm165_vm1, %v914_v37, %v2071_v52  ;;  %v917_v7 = vsel %vm165_vm1, %v916_v56, %v2106_v6  ;;  %276 = vmatpush.msra.mxu1 %v275_v57  ;;  %v160_v37 = vld [vmem:[%s3174_s1 + $0xf8] sm:$0xff]  ;;  %v2145_v49 = vsub.f32 %v130_v58, %v2129_v35  ;;  %199 = vmatpush.msra.mxu0 %v2129_v35  ;;  %v159_v56 = vld [vmem:[%s3174_s1 + $0xf0] sm:$0xff]  ;;  %v2152_v57 = vand.u32 4294901760, %v129_v38 }
 0x12a   :  { %920 = vrot.lane.b32.xlu2 %v915_v53, %s1834_s19  ;;  %v2138_v39 = vand.u32 4294901760, %v160_v37  ;;  %v281_v53 = vand.u32 4294901760, %v280_v62  ;;  %353 = vmatpush.msra.mxu2 %v2125_v29  ;;  %v286_v48 = vsub.f32 %v2101_v61, %v3178_v31  ;;  %v292_v62 = vsub.f32 %v2125_v29, %v3181_v55 }
 0x12b   :  { %395 = vmatpush.msra.mxu3 %v2129_v35  ;;  %v3184_v31 = vand.u32 4294901760, %v2145_v49  ;;  %v2169_v32 = vsub.f32 %v129_v38, %v2152_v57  ;;  %201 = vmatpush.msra.mxu0 %v2152_v57  ;;  %v157_v38 = vld [vmem:[%s3174_s1 + $0xe0] sm:$0xff] }
 0x12c   :  { %v2158_v8 = vsub.f32 %v160_v37, %v2138_v39  ;;  %282 = vmatpush.msra.mxu1 %v281_v53  ;;  %v287_v58 = vand.u32 4294901760, %v286_v48  ;;  %356 = vmatpush.msra.mxu2 %v2145_v49  ;;  %v2174_v53 = vand.u32 4294901760, %v158_v13  ;;  %v293_v55 = vand.u32 4294901760, %v292_v62 }
 0x12d   :  { %397 = vmatpush.msra.mxu3 %v2152_v57  ;;  %v298_v12 = vsub.f32 %v2145_v49, %v3184_v31  ;;  %408 = vmatpush.msrb.mxu0 %v213_v21  ;;  %v2193_v59 = vand.u32 4294901760, %v157_v38  ;;  %v156_v31 = vld [vmem:[%s3174_s1 + $0xd8] sm:$0xff] }
 0x12e   :  { %v3186_v37 = vand.u32 4294901760, %v2158_v8  ;;  %288 = vmatpush.msra.mxu1 %v287_v58  ;;  %359 = vmatpush.msra.mxu2 %v2169_v32  ;;  %v3187_v58 = vand.u32 4294901760, %v2169_v32  ;;  %v2197_v21 = vsub.f32 %v158_v13, %v2174_v53 }
 0x12f   :  { %v299_v14 = vand.u32 4294901760, %v298_v12  ;;  %412 = vmatpush.msrb.mxu0 %v219_v22  ;;  %v2210_v12 = vand.u32 4294901760, %v156_v31 }
 0x130   :  { %294 = vmatpush.msra.mxu1 %v293_v55  ;;  %512 = vmatpush.msrb.mxu2 %v2138_v39  ;;  %v3192_v13 = vand.u32 4294901760, %v2197_v21 }
 0x131   :  { %3232 = vst [vmem:[#allocation8_spill] sm:$0xff] %v2210_v12  ;;  %416 = vmatpush.msrb.mxu0 %v225_v23 }
 0x132   :  { %922 = vrot.lane.b32.xlu2 %v917_v7, %s1834_s19  ;;  %v2155_v7 = vand.u32 4294901760, %v159_v56  ;;  %300 = vmatpush.msra.mxu1 %v299_v14  ;;  %v2225_v14 = vsub.f32 %v156_v31, %v2210_v12 }
 0x133   :  { %420 = vmatpush.msrb.mxu0 %v231_v26 }
 0x134   :  { %v2177_v48 = vsub.f32 %v159_v56, %v2155_v7  ;;  %v555_v56 = vsub.f32 %v2158_v8, %v3186_v37  ;;  %v304_v37 = vsub.f32 %v2169_v32, %v3187_v58  ;;  %514 = vmatpush.msrb.mxu2 %v2155_v7  ;;  %v155_v58 = vld [vmem:[%s3174_s1 + $0xd0] sm:$0xff]  ;;  %v3191_v16 = vand.u32 4294901760, %v2225_v14 }
 0x135   :  { %424 = vmatpush.msrb.mxu0 %v237_v27  ;;  %v2282_v27 = vsel %vm53_vm0, %v1871_v2, 0.0  ;;  %v150_v2 = vld [vmem:[%s3174_s1 + $0xa8] sm:$0xff] }
 0x136   :  { %v3188_v62 = vand.u32 4294901760, %v2177_v48  ;;  %v556_v50 = vand.u32 4294901760, %v555_v56  ;;  %v2215_v56 = vsub.f32 %v157_v38, %v2193_v59  ;;  %v305_v15 = vand.u32 4294901760, %v304_v37  ;;  %516 = vmatpush.msrb.mxu2 %v2174_v53 }
 0x137   :  { %v567_v38 = vsub.f32 %v2197_v21, %v3192_v13  ;;  %v2271_v13 = vand.u32 4294901760, %v152_v18  ;;  %428 = vmatpush.msrb.mxu0 %v243_v33  ;;  %v3240_v33 = vand.u32 4294901760, %v2003_v40 }
 0x138   :  { %v561_v55 = vsub.f32 %v2177_v48, %v3188_v62  ;;  %557 = vmatpush.msrb.mxu3 %v556_v50  ;;  %v2222_v62 = vand.u32 4294901760, %v155_v58  ;;  %v3190_v42 = vand.u32 4294901760, %v2215_v56  ;;  %v154_v50 = vld [vmem:[%s3174_s1 + $0xc8] sm:$0xff]  ;;  %306 = vmatpush.msra.mxu1 %v305_v15  ;;  %v153_v15 = vld [vmem:[%s3174_s1 + $0xc0] sm:$0xff] }
 0x139   :  { %v2236_v23 = vand.u32 4294901760, %v154_v50  ;;  %518 = vmatpush.msrb.mxu2 %v2193_v59  ;;  %v568_v37 = vand.u32 4294901760, %v567_v38 }
 0x13a   :  { %v562_v22 = vand.u32 4294901760, %v561_v55  ;;  %3233 = vst [vmem:[#allocation9_spill] sm:$0xff] %v2222_v62  ;;  %v2239_v31 = vsub.f32 %v155_v58, %v2222_v62  ;;  %475 = vmatpush.msrb.mxu1 %v1911_v63  ;;  %v573_v55 = vsub.f32 %v2215_v56, %v3190_v42  ;;  %v579_v58 = vsub.f32 %v2225_v14, %v3191_v16 }
 0x13b   :  { %3234 = vst [vmem:[#allocation10_spill] sm:$0xff] %v2236_v23  ;;  %v2258_v38 = vsub.f32 %v154_v50, %v2236_v23  ;;  %520 = vmatpush.msrb.mxu2 %v2210_v12  ;;  %v145_v12 = vld [vmem:[%s3174_s1 + $0x80] sm:$0xff] }
 0x13c   :  { %563 = vmatpush.msrb.mxu3 %v562_v22  ;;  %3235 = vst [vmem:[#allocation11_spill] sm:$0xff] %v2239_v31  ;;  %v3194_v63 = vand.u32 4294901760, %v2239_v31  ;;  %v2255_v22 = vand.u32 4294901760, %v153_v15  ;;  %477 = vmatpush.msrb.mxu1 %v1913_v0  ;;  %v574_v42 = vand.u32 4294901760, %v573_v55  ;;  %v580_v26 = vand.u32 4294901760, %v579_v58 }
 0x13d   :  { %3237 = vst [vmem:[#allocation13_spill] sm:$0xff] %v2258_v38  ;;  %v3193_v50 = vand.u32 4294901760, %v2258_v38  ;;  %522 = vmatpush.msrb.mxu2 %v2222_v62  ;;  %v2294_v55 = vand.u32 4294901760, %v151_v19 }
 0x13e   :  { %3236 = vst [vmem:[#allocation12_spill] sm:$0xff] %v2255_v22  ;;  %569 = vmatpush.msrb.mxu3 %v568_v37  ;;  %v585_v16 = vsub.f32 %v2239_v31, %v3194_v63  ;;  %479 = vmatpush.msrb.mxu1 %v1915_v1  ;;  %v2275_v0 = vsub.f32 %v153_v15, %v2255_v22  ;;  %v2286_v37 = vsel %vm53_vm0, %v1875_v4, 0.0  ;;  %v149_v4 = vld [vmem:[%s3174_s1 + $0xa0] sm:$0xff]  ;;  %v146_v63 = vld [vmem:[%s3174_s1 + $0x88] sm:$0xff] }
 0x13f   :  { %v2297_v15 = vsub.f32 %v152_v18, %v2271_v13  ;;  %v2312_v58 = vand.u32 4294901760, %v149_v4  ;;  %v2314_v18 = vand.u32 4294901760, %v148_v20  ;;  %524 = vmatpush.msrb.mxu2 %v2236_v23  ;;  %v2327_v62 = vsub.f32 %v151_v19, %v2294_v55 }
 0x140   :  { %575 = vmatpush.msrb.mxu3 %v574_v42  ;;  %v586_v1 = vand.u32 4294901760, %v585_v16  ;;  %v591_v42 = vsub.f32 %v2258_v38, %v3193_v50  ;;  %481 = vmatpush.msrb.mxu1 %v1926_v9  ;;  %v2310_v16 = vand.u32 4294901760, %v150_v2  ;;  %v147_v50 = vld [vmem:[%s3174_s1 + $0x90] sm:$0xff]  ;;  %v3238_v9 = vand.u32 4294901760, %v1974_v28  ;;  %s1835_s1 = smov 120  }
 0x141   :  { %v2329_v38 = vand.u32 4294901760, %v147_v50  ;;  %v3239_v23 = vand.u32 4294901760, %v2275_v0  ;;  %v2344_v19 = vand.u32 4294901760, %v146_v63  ;;  %526 = vmatpush.msrb.mxu2 %v2255_v22  ;;  %v3207_v31 = vand.u32 4294901760, %v2327_v62 }
 0x142   :  { %581 = vmatpush.msrb.mxu3 %v580_v26  ;;  %432 = vmatpush.msrb.mxu0 %v3238_v9  ;;  %v592_v26 = vand.u32 4294901760, %v591_v42  ;;  %v2339_v42 = vsub.f32 %v150_v2, %v2310_v16  ;;  %v2342_v9 = vsub.f32 %v149_v4, %v2312_v58 }
 0x143   :  { %483 = vmatpush.msrb.mxu1 %v1928_v10  ;;  %v597_v28 = vsub.f32 %v2275_v0, %v3239_v23  ;;  %v3241_v10 = vand.u32 4294901760, %v2297_v15  ;;  %v2354_v23 = vsub.f32 %v148_v20, %v2314_v18  ;;  %v2357_v2 = vsub.f32 %v147_v50, %v2329_v38  ;;  %528 = vmatpush.msrb.mxu2 %v2271_v13 }
 0x144   :  { %587 = vmatpush.msrb.mxu3 %v586_v1  ;;  %436 = vmatpush.msrb.mxu0 %v3240_v33  ;;  %v3208_v22 = vand.u32 4294901760, %v2339_v42  ;;  %v3209_v40 = vand.u32 4294901760, %v2342_v9  ;;  %v2362_v33 = vand.u32 4294901760, %v145_v12  ;;  %v609_v50 = vsub.f32 %v2327_v62, %v3207_v31 }
 0x145   :  { %v603_v1 = vsub.f32 %v2297_v15, %v3241_v10  ;;  %485 = vmatpush.msrb.mxu1 %v1930_v11  ;;  %v598_v4 = vand.u32 4294901760, %v597_v28  ;;  %v3242_v10 = vand.u32 4294901760, %v2012_v44  ;;  %v3210_v11 = vand.u32 4294901760, %v2354_v23  ;;  %530 = vmatpush.msrb.mxu2 %v2294_v55 }
 0x146   :  { %593 = vmatpush.msrb.mxu3 %v592_v26  ;;  %v615_v28 = vsub.f32 %v2339_v42, %v3208_v22  ;;  %v621_v44 = vsub.f32 %v2342_v9, %v3209_v40  ;;  %v3243_v31 = vand.u32 4294901760, %v2027_v51  ;;  %v3244_v51 = vand.u32 4294901760, %v2037_v60 }
 0x147   :  { %440 = vmatpush.msrb.mxu0 %v3242_v10  ;;  %v604_v20 = vand.u32 4294901760, %v603_v1  ;;  %487 = vmatpush.msrb.mxu1 %v1949_v17  ;;  %v2380_v1 = vsub.f32 %v146_v63, %v2344_v19  ;;  %v55_v10 = vrot.slane %v2282_v27, 4  ;;  %v610_v17 = vand.u32 4294901760, %v609_v50 }
 0x148   :  { %599 = vmatpush.msrb.mxu3 %v598_v4  ;;  %v69_v4 = vrot.slane %v2286_v37, 4  ;;  %v616_v22 = vand.u32 4294901760, %v615_v28  ;;  %v627_v40 = vsub.f32 %v2354_v23, %v3210_v11  ;;  %532 = vmatpush.msrb.mxu2 %v2310_v16  ;;  %v2398_v50 = vsub.f32 %v145_v12, %v2362_v33 }
 0x149   :  { %444 = vmatpush.msrb.mxu0 %v3243_v31  ;;  %489 = vmatpush.msrb.mxu1 %v1965_v24  ;;  %v638_v63 = vand.u32 4294901760, %v2380_v1  ;;  %v56_v26 = vadd.f32 %v55_v10, %v2282_v27  ;;  %v622_v24 = vand.u32 4294901760, %v621_v44  ;;  %v3246_v27 = vand.u32 4294901760, %v2094_v54 }
 0x14a   :  { %605 = vmatpush.msrb.mxu3 %v604_v20  ;;  %v70_v31 = vadd.f32 %v69_v4, %v2286_v37  ;;  %v3245_v20 = vand.u32 4294901760, %v2357_v2  ;;  %534 = vmatpush.msrb.mxu2 %v2312_v58  ;;  %v644_v37 = vand.u32 4294901760, %v2398_v50  ;;  %v628_v12 = vand.u32 4294901760, %v627_v40 }
 0x14b   :  { %448 = vmatpush.msrb.mxu0 %v3244_v51  ;;  %491 = vmatpush.msrb.mxu1 %v1989_v34  ;;  %v57_v11 = vrot.slane %v56_v26, 2  ;;  %v639_v34 = vsub.f32 %v2380_v1, %v638_v63  ;;  %v3247_v10 = vand.u32 4294901760, %v2101_v61 }
 0x14c   :  { %611 = vmatpush.msrb.mxu3 %v610_v17  ;;  %v633_v28 = vsub.f32 %v2357_v2, %v3245_v20  ;;  %v71_v60 = vrot.slane %v70_v31, 2  ;;  %536 = vmatpush.msrb.mxu2 %v2314_v18  ;;  %v75_v20 = vsel %vm53_vm0, %v1877_v5, 0.0 }
 0x14d   :  { %452 = vmatpush.msrb.mxu0 %v3246_v27  ;;  %493 = vmatpush.msrb.mxu1 %v2014_v45  ;;  %v58_v44 = vadd.f32 %v57_v11, %v56_v26  ;;  %v645_v45 = vsub.f32 %v2398_v50, %v644_v37  ;;  %v640_v61 = vand.u32 4294901760, %v639_v34 }
 0x14e   :  { %617 = vmatpush.msrb.mxu3 %v616_v22  ;;  %v72_v17 = vadd.f32 %v71_v60, %v70_v31  ;;  %v634_v4 = vand.u32 4294901760, %v633_v28  ;;  %538 = vmatpush.msrb.mxu2 %v2329_v38  ;;  %v3248_v22 = vand.u32 4294901760, %v2125_v29  ;;  %v76_v28 = vrot.slane %v75_v20, 4 }
 0x14f   :  { %456 = vmatpush.msrb.mxu0 %v3247_v10  ;;  %495 = vmatpush.msrb.mxu1 %v2016_v47  ;;  %v59_v51 = vrot.slane %v58_v44, 1  ;;  %v3249_v47 = vand.u32 4294901760, %v2145_v49  ;;  %v646_v31 = vand.u32 4294901760, %v645_v45  ;;  %v3252_v45 = vand.u32 4294901760, %v2177_v48 }
 0x150   :  { %623 = vmatpush.msrb.mxu3 %v622_v24  ;;  %v73_v40 = vrot.slane %v72_v17, 1  ;;  %540 = vmatpush.msrb.mxu2 %v2344_v19  ;;  %v3250_v24 = vand.u32 4294901760, %v2169_v32 }
 0x151   :  { %460 = vmatpush.msrb.mxu0 %v3248_v22  ;;  %497 = vmatpush.msrb.mxu1 %v2068_v36  ;;  %v60_v11 = vadd.f32 %v59_v51, %v58_v44  ;;  %v61_v36 = vsel %vm53_vm0, %v1873_v3, 0.0  ;;  %v77_v3 = vadd.f32 %v76_v28, %v75_v20  ;;  %v3255_v20 = vand.u32 4294901760, %v2225_v14 }
 0x152   :  { %629 = vmatpush.msrb.mxu3 %v628_v12  ;;  %v74_v26 = vadd.f32 %v73_v40, %v72_v17  ;;  %542 = vmatpush.msrb.mxu2 %v2362_v33  ;;  %v62_v49 = vrot.slane %v61_v36, 4 }
 0x153   :  { %464 = vmatpush.msrb.mxu0 %v3249_v47  ;;  %499 = vmatpush.msrb.mxu1 %v2080_v41  ;;  %v3253_v47 = vand.u32 4294901760, %v2197_v21 }
 0x154   :  { %635 = vmatpush.msrb.mxu3 %v634_v4  ;;  %v166_v29 = vsel %vm165_vm1, %v74_v26, %v60_v11  ;;  %v63_v32 = vadd.f32 %v62_v49, %v61_v36  ;;  %v3256_v49 = vld [vmem:[#allocation11_spill] sm:$0xff] }
 0x155   :  { %468 = vmatpush.msrb.mxu0 %v3250_v24  ;;  %501 = vmatpush.msrb.mxu1 %v2116_v25  ;;  %v2437_v41 = vand.u32 4294901760, %v166_v29  ;;  %v3251_v25 = vand.u32 4294901760, %v2158_v8  ;;  %v3254_v24 = vand.u32 4294901760, %v2215_v56  ;;  %v3257_v28 = vand.u32 4294901760, %v3256_v49 }
 0x156   :  { %641 = vmatpush.msrb.mxu3 %v640_v61  ;;  %v64_v17 = vrot.slane %v63_v32, 2 }
 0x157   :  { %v203_v60 = vsub.f32 %v166_v29, %v2437_v41  ;;  %503 = vmatpush.msrb.mxu1 %v2129_v35  ;;  %v78_v35 = vrot.slane %v77_v3, 2 }
 0x158   :  { %647 = vmatpush.msrb.mxu3 %v646_v31  ;;  %308 = vmatmul.f32.vlgmr.msra.gmra.mxu1 %v2437_v41 }
 0x159   :  { %362 = vmatmul.f32.vlgmr.msra.gmra.mxu2 %v203_v60  ;;  %505 = vmatpush.msrb.mxu1 %v2152_v57  ;;  %v204_v10 = vand.u32 4294901760, %v203_v60  ;;  %v65_v57 = vadd.f32 %v64_v17, %v63_v32  ;;  %v79_v22 = vadd.f32 %v78_v35, %v77_v3  ;;  %v3261_v32 = vld [vmem:[#allocation9_spill] sm:$0xff]  ;;  %v3263_v3 = vld [vmem:[#allocation10_spill] sm:$0xff] }
 0x15a   :  { %749 = vmatpush.msra.mxu2 %v3251_v25  ;;  %v981_v25 = vld [vmem:[%s3175_s2 + $0x68] sm:$0xff] }
 0x15b   :  { %708 = vmatpush.msra.mxu1 %v2138_v39  ;;  %v205_v51 = vsub.f32 %v203_v60, %v204_v10  ;;  %401 = vmatmul.f32.vlgmr.msra.gmra.mxu3 %v204_v10  ;;  %v66_v26 = vrot.slane %v65_v57, 1  ;;  %v80_v31 = vrot.slane %v79_v22, 1  ;;  %v3267_v10 = vand.u32 4294901760, %v2339_v42 }
 0x15c   :  { %753 = vmatpush.msra.mxu2 %v3252_v45  ;;  %816 = vmatpush.msra.mxu3 %v2138_v39 }
 0x15d   :  { %710 = vmatpush.msra.mxu1 %v2155_v7  ;;  %v67_v39 = vadd.f32 %v66_v26, %v65_v57  ;;  %v81_v29 = vadd.f32 %v80_v31, %v79_v22  ;;  %v2543_v57 = vand.u32 4294901760, %v981_v25 }
 0x15e   :  { %757 = vmatpush.msra.mxu2 %v3253_v47  ;;  %818 = vmatpush.msra.mxu3 %v2155_v7  ;;  %v3270_v47 = vand.u32 4294901760, %v2357_v2 }
 0x15f   :  { %712 = vmatpush.msra.mxu1 %v2174_v53  ;;  %v167_v36 = vsel %vm165_vm1, %v81_v29, %v67_v39 }
 0x160   :  { %761 = vmatpush.msra.mxu2 %v3254_v24  ;;  %820 = vmatpush.msra.mxu3 %v2174_v53  ;;  %v2480_v7 = vand.u32 4294901760, %v167_v36  ;;  %v3259_v53 = vld [vmem:[#allocation13_spill] sm:$0xff] }
 0x161   :  { %714 = vmatpush.msra.mxu1 %v2193_v59  ;;  %v3260_v60 = vand.u32 4294901760, %v3259_v53 }
 0x162   :  { %765 = vmatpush.msra.mxu2 %v3255_v20  ;;  %822 = vmatpush.msra.mxu3 %v2193_v59  ;;  %v3262_v59 = vand.u32 4294901760, %v2275_v0 }
 0x163   :  { %649 = vmatmul.f32.vlgmr.msrb.gmra.mxu3 %v2480_v7  ;;  %507 = vmatmul.f32.vlgmr.msrb.gmra.mxu1 %v2437_v41 }
 0x164   :  { %769 = vmatpush.msra.mxu2 %v3257_v28 }
 0x166   :  { %773 = vmatpush.msra.mxu2 %v3260_v60 }
 0x168   :  { %777 = vmatpush.msra.mxu2 %v3262_v59 }
 0x184   :  { %v921_v54 = vpop.permute.xlu2 %920 }
 0x18c   :  { %v923_v27 = vpop.permute.xlu2 %922 }
 0x18d   :  { %v925_v12 = vsel %vm924_vm4, %v921_v54, %v923_v27  ;;  %v926_v34 = vsel %vm924_vm4, %v923_v27, %v921_v54  ;;  %v3258_v27 = vld [vmem:[#allocation8_spill] sm:$0xff] }
 0x18e   :  { %v929_v5 = vrot.slane %v925_v12, 1  ;;  %v930_v44 = vrot.slane %v926_v34, 1  ;;  %v2455_v40 = vmax.f32 %v2071_v52, %v925_v12  ;;  %v2458_v61 = vmax.f32 %v2106_v6, %v926_v34  ;;  %716 = vmatpush.msra.mxu1 %v3258_v27  ;;  %824 = vmatpush.msra.mxu3 %v3258_v27  ;;  %v3265_v34 = vld [vmem:[#allocation12_spill] sm:$0xff] }
 0x18f   :  { %v3264_v12 = vand.u32 4294901760, %v2297_v15 }
 0x190   :  { %v2447_v4 = vmax.f32 %v2056_v30, %v929_v5  ;;  %v2450_v54 = vmax.f32 %v2083_v43, %v930_v44  ;;  %v206_v43 = vand.u32 4294901760, %v205_v51  ;;  %718 = vmatpush.msra.mxu1 %v3261_v32  ;;  %826 = vmatpush.msra.mxu3 %v3261_v32  ;;  %v3266_v5 = vand.u32 4294901760, %v2327_v62 }
 0x191   :  { %781 = vmatpush.msra.mxu2 %v3264_v12  ;;  %v3268_v51 = vand.u32 4294901760, %v2342_v9 }
 0x192   :  { %v945_v11 = vrot.slane %v2450_v54, 7  ;;  %v943_v30 = vrot.slane %v2447_v4, 7  ;;  %207 = vmatmul.f32.vlgmr.msra.gmra.mxu0 %v206_v43  ;;  %720 = vmatpush.msra.mxu1 %v3263_v3 }
 0x193   :  { %655 = vmatpush.msra.mxu0 %v2158_v8  ;;  %v2488_v8 = vsub.f32 %v167_v36, %v2480_v7  ;;  %828 = vmatpush.msra.mxu3 %v3263_v3 }
 0x194   :  { %v946_v52 = vsel %vm165_vm1, %v945_v11, %v2458_v61  ;;  %v944_v6 = vsel %vm165_vm1, %v943_v30, %v2455_v40  ;;  %722 = vmatpush.msra.mxu1 %v3265_v34  ;;  %785 = vmatpush.msra.mxu2 %v3266_v5  ;;  %v3269_v11 = vand.u32 4294901760, %v2354_v23  ;;  %v2566_v30 = vsub.f32 %v981_v25, %v2543_v57 }
 0x195   :  { %951 = vrot.lane.b32.xlu1 %v946_v52, %s1835_s1  ;;  %949 = vrot.lane.b32.xlu0 %v944_v6, %s1835_s1  ;;  %v976_v52 = vld [vmem:[%s3175_s2 + $0x40] sm:$0xff] }
 0x196   :  { %658 = vmatpush.msra.mxu0 %v2177_v48  ;;  %v545_v48 = vand.u32 4294901760, %v2488_v8  ;;  %830 = vmatpush.msra.mxu3 %v3265_v34  ;;  %v3224_v39 = vand.u32 4294901760, %v2566_v30 }
 0x197   :  { %724 = vmatpush.msra.mxu1 %v2271_v13  ;;  %789 = vmatpush.msra.mxu2 %v3267_v10 }
 0x198   :  { %661 = vmatpush.msra.mxu0 %v2197_v21  ;;  %v983_v21 = vld [vmem:[%s3175_s2 + $0x78] sm:$0xff]  ;;  %832 = vmatpush.msra.mxu3 %v2271_v13  ;;  %v980_v13 = vld [vmem:[%s3175_s2 + $0x60] sm:$0xff]  ;;  %v1066_v36 = vsub.f32 %v2566_v30, %v3224_v39 }
 0x199   :  { %v2520_v44 = vand.u32 4294901760, %v983_v21  ;;  %726 = vmatpush.msra.mxu1 %v2294_v55  ;;  %793 = vmatpush.msra.mxu2 %v3268_v51  ;;  %v2554_v22 = vand.u32 4294901760, %v980_v13  ;;  %v969_v51 = vld [vmem:[%s3175_s2 + $0x8] sm:$0xff] }
 0x19a   :  { %664 = vmatpush.msra.mxu0 %v2215_v56  ;;  %v546_v56 = vsub.f32 %v2488_v8, %v545_v48  ;;  %834 = vmatpush.msra.mxu3 %v2294_v55 }
 0x19b   :  { %728 = vmatpush.msra.mxu1 %v2310_v16  ;;  %v2541_v45 = vsub.f32 %v983_v21, %v2520_v44  ;;  %470 = vmatmul.f32.vlgmr.msrb.gmra.mxu0 %v2437_v41  ;;  %v2580_v26 = vsub.f32 %v980_v13, %v2554_v22 }
 0x19c   :  { %667 = vmatpush.msra.mxu0 %v2225_v14  ;;  %v982_v14 = vld [vmem:[%s3175_s2 + $0x70] sm:$0xff]  ;;  %v547_v17 = vand.u32 4294901760, %v546_v56  ;;  %836 = vmatpush.msra.mxu3 %v2310_v16 }
 0x19d   :  { %v2530_v35 = vand.u32 4294901760, %v982_v14  ;;  %797 = vmatpush.msra.mxu2 %v3269_v11  ;;  %730 = vmatpush.msra.mxu1 %v2312_v58  ;;  %v3228_v16 = vand.u32 4294901760, %v2541_v45  ;;  %v3223_v41 = vand.u32 4294901760, %v2580_v26 }
 0x19e   :  { %670 = vmatpush.msra.mxu0 %v3256_v49  ;;  %548 = vmatmul.f32.vlgmr.msrb.gmra.mxu2 %v547_v17 }
 0x19f   :  { %v2552_v55 = vsub.f32 %v982_v14, %v2530_v35  ;;  %838 = vmatpush.msra.mxu3 %v2312_v58  ;;  %801 = vmatpush.msra.mxu2 %v3270_v47  ;;  %v1054_v6 = vsub.f32 %v2541_v45, %v3228_v16  ;;  %v1072_v27 = vsub.f32 %v2580_v26, %v3223_v41  ;;  %v970_v14 = vld [vmem:[%s3175_s2 + $0x10] sm:$0xff] }
 0x1a0   :  { %673 = vmatpush.msra.mxu0 %v3259_v53  ;;  %732 = vmatpush.msra.mxu1 %v2314_v18 }
 0x1a1   :  { %840 = vmatpush.msra.mxu3 %v2314_v18  ;;  %v3226_v58 = vand.u32 4294901760, %v2552_v55  ;;  %805 = vmatpush.msra.mxu2 %v638_v63  ;;  %v975_v18 = vld [vmem:[%s3175_s2 + $0x38] sm:$0xff]  ;;  %v1073_v3 = vand.u32 4294901760, %v1072_v27 }
 0x1a2   :  { %676 = vmatpush.msra.mxu0 %v2275_v0  ;;  %v979_v0 = vld [vmem:[%s3175_s2 + $0x58] sm:$0xff]  ;;  %734 = vmatpush.msra.mxu1 %v2329_v38  ;;  %v2632_v20 = vand.u32 4294901760, %v975_v18 }
 0x1a3   :  { %v2568_v43 = vand.u32 4294901760, %v979_v0  ;;  %842 = vmatpush.msra.mxu3 %v2329_v38  ;;  %809 = vmatpush.msra.mxu2 %v644_v37  ;;  %v1060_v63 = vsub.f32 %v2552_v55, %v3226_v58  ;;  %v974_v38 = vld [vmem:[%s3175_s2 + $0x30] sm:$0xff]  ;;  %v1055_v37 = vand.u32 4294901760, %v1054_v6 }
 0x1a4   :  { %679 = vmatpush.msra.mxu0 %v2297_v15  ;;  %v978_v15 = vld [vmem:[%s3175_s2 + $0x50] sm:$0xff]  ;;  %736 = vmatpush.msra.mxu1 %v2344_v19  ;;  %v2648_v53 = vand.u32 4294901760, %v974_v38  ;;  %v2662_v59 = vsub.f32 %v975_v18, %v2632_v20 }
 0x1a5   :  { %v2582_v31 = vand.u32 4294901760, %v978_v15  ;;  %v2599_v29 = vsub.f32 %v979_v0, %v2568_v43  ;;  %844 = vmatpush.msra.mxu3 %v2344_v19  ;;  %v973_v19 = vld [vmem:[%s3175_s2 + $0x28] sm:$0xff]  ;;  %v1061_v28 = vand.u32 4294901760, %v1060_v63  ;;  %1154 = vmatpush.msrb.mxu2 %v2541_v45 }
 0x1a6   :  { %682 = vmatpush.msra.mxu0 %v2327_v62  ;;  %v977_v62 = vld [vmem:[%s3175_s2 + $0x48] sm:$0xff]  ;;  %811 = vmatmul.f32.vlgmr.msra.gmra.mxu2 %v2480_v7  ;;  %v2677_v12 = vsub.f32 %v974_v38, %v2648_v53  ;;  %v3216_v25 = vand.u32 4294901760, %v2662_v59  ;;  %v2724_v38 = vand.u32 4294901760, %v969_v51 }
 0x1a7   :  { %846 = vmatpush.msra.mxu3 %v2362_v33  ;;  %738 = vmatpush.msra.mxu1 %v2362_v33  ;;  %v972_v33 = vld [vmem:[%s3175_s2 + $0x20] sm:$0xff] }
 0x1a8   :  { %685 = vmatpush.msra.mxu0 %v2339_v42  ;;  %v2589_v42 = vand.u32 4294901760, %v977_v62  ;;  %848 = vmatmul.f32.vlgmr.msra.gmra.mxu3 %v2480_v7  ;;  %v1067_v7 = vand.u32 4294901760, %v1066_v36  ;;  %v2679_v34 = vand.u32 4294901760, %v972_v33  ;;  %v3214_v11 = vand.u32 4294901760, %v2677_v12 }
 0x1a9   :  { %742 = vmatmul.f32.vlgmr.msra.gmra.mxu1 %v545_v48  ;;  %1207 = vmatpush.msrb.mxu3 %v2520_v44  ;;  %v1102_v6 = vsub.f32 %v2662_v59, %v3216_v25  ;;  %v994_v25 = vld [vmem:[%s3175_s2 + $0xd0] sm:$0xff] }
 0x1aa   :  { %688 = vmatpush.msra.mxu0 %v2342_v9  ;;  %v2603_v9 = vand.u32 4294901760, %v976_v52  ;;  %v2621_v24 = vsub.f32 %v977_v62, %v2589_v42  ;;  %1056 = vmatpush.msrb.mxu1 %v1055_v37  ;;  %v2709_v62 = vand.u32 4294901760, %v970_v14  ;;  %v1108_v36 = vsub.f32 %v2677_v12, %v3214_v11  ;;  %v995_v11 = vld [vmem:[%s3175_s2 + $0xd8] sm:$0xff] }
 0x1ab   :  { %1157 = vmatpush.msrb.mxu2 %v2552_v55  ;;  %1209 = vmatpush.msrb.mxu3 %v2530_v35 }
 0x1ac   :  { %691 = vmatpush.msra.mxu0 %v2354_v23  ;;  %v2616_v23 = vsub.f32 %v978_v15, %v2582_v31  ;;  %v2637_v49 = vsub.f32 %v976_v52, %v2603_v9  ;;  %v3219_v60 = vand.u32 4294901760, %v2621_v24  ;;  %1062 = vmatpush.msrb.mxu1 %v1061_v28  ;;  %v2707_v15 = vsub.f32 %v972_v33, %v2679_v34  ;;  %v968_v52 = vld [vmem:[%s3175_s2] sm:$0xff]  ;;  %v999_v33 = vld [vmem:[%s3175_s2 + $0xf8] sm:$0xff] }
 0x1ad   :  { %1160 = vmatpush.msrb.mxu2 %v2566_v30  ;;  %1211 = vmatpush.msrb.mxu3 %v2543_v57  ;;  %v2734_v28 = vsub.f32 %v970_v14, %v2709_v62  ;;  %v2736_v27 = vand.u32 4294901760, %v968_v52  ;;  %v1109_v14 = vand.u32 4294901760, %v1108_v36  ;;  %v996_v36 = vld [vmem:[%s3175_s2 + $0xe0] sm:$0xff] }
 0x1ae   :  { %694 = vmatpush.msra.mxu0 %v2357_v2  ;;  %v3222_v2 = vand.u32 4294901760, %v2599_v29  ;;  %v3217_v48 = vand.u32 4294901760, %v2637_v49  ;;  %v1090_v56 = vsub.f32 %v2621_v24, %v3219_v60  ;;  %1068 = vmatpush.msrb.mxu1 %v1067_v7  ;;  %v1103_v7 = vand.u32 4294901760, %v1102_v6  ;;  %v993_v60 = vld [vmem:[%s3175_s2 + $0xc8] sm:$0xff] }
 0x1af   :  { %1163 = vmatpush.msrb.mxu2 %v2580_v26  ;;  %1213 = vmatpush.msrb.mxu3 %v2554_v22 }
 0x1b0   :  { %697 = vmatpush.msra.mxu0 %v2380_v1  ;;  %v3220_v1 = vand.u32 4294901760, %v2616_v23  ;;  %v1078_v32 = vsub.f32 %v2599_v29, %v3222_v2  ;;  %v1096_v13 = vsub.f32 %v2637_v49, %v3217_v48  ;;  %1074 = vmatpush.msrb.mxu1 %v1073_v3  ;;  %v1091_v47 = vand.u32 4294901760, %v1090_v56 }
 0x1b1   :  { %1166 = vmatpush.msrb.mxu2 %v2599_v29  ;;  %1215 = vmatpush.msrb.mxu3 %v2568_v43  ;;  %v2749_v3 = vsub.f32 %v969_v51, %v2724_v38  ;;  %v2756_v56 = vand.u32 4294901760, %v999_v33  ;;  %v2764_v51 = vsub.f32 %v968_v52, %v2736_v27 }
 0x1b2   :  { %700 = vmatpush.msra.mxu0 %v2398_v50  ;;  %v2664_v50 = vand.u32 4294901760, %v973_v19  ;;  %v1084_v21 = vsub.f32 %v2616_v23, %v3220_v1  ;;  %v1079_v5 = vand.u32 4294901760, %v1078_v32  ;;  %v1097_v37 = vand.u32 4294901760, %v1096_v13 }
 0x1b3   :  { %703 = vmatmul.f32.vlgmr.msra.gmra.mxu0 %v2488_v8  ;;  %v971_v8 = vld [vmem:[%s3175_s2 + $0x18] sm:$0xff]  ;;  %1169 = vmatpush.msrb.mxu2 %v2616_v23  ;;  %v3215_v13 = vand.u32 4294901760, %v2734_v28  ;;  %v3218_v52 = vand.u32 4294901760, %v2749_v3 }
 0x1b4   :  { %1011 = vmatpush.msrb.mxu0 %v2520_v44  ;;  %v2692_v10 = vsub.f32 %v973_v19, %v2664_v50  ;;  %v2694_v17 = vand.u32 4294901760, %v971_v8  ;;  %v1085_v0 = vand.u32 4294901760, %v1084_v21  ;;  %1080 = vmatpush.msrb.mxu1 %v1079_v5  ;;  %v3211_v19 = vand.u32 4294901760, %v2707_v15  ;;  %v998_v21 = vld [vmem:[%s3175_s2 + $0xf0] sm:$0xff] }
 0x1b5   :  { %1217 = vmatpush.msrb.mxu3 %v2582_v31  ;;  %1172 = vmatpush.msrb.mxu2 %v2621_v24 }
 0x1b6   :  { %1013 = vmatpush.msrb.mxu0 %v2530_v35  ;;  %v3213_v18 = vand.u32 4294901760, %v2692_v10  ;;  %v2722_v63 = vsub.f32 %v971_v8, %v2694_v17  ;;  %1086 = vmatpush.msrb.mxu1 %v1085_v0  ;;  %v1120_v5 = vsub.f32 %v2707_v15, %v3211_v19  ;;  %v997_v0 = vld [vmem:[%s3175_s2 + $0xe8] sm:$0xff]  ;;  %v2784_v19 = vsub.f32 %v999_v33, %v2756_v56 }
 0x1b7   :  { %1219 = vmatpush.msrb.mxu3 %v2589_v42  ;;  %1175 = vmatpush.msrb.mxu2 %v2637_v49 }
 0x1b8   :  { %1015 = vmatpush.msrb.mxu0 %v2543_v57  ;;  %1092 = vmatpush.msrb.mxu1 %v1091_v47  ;;  %v1114_v32 = vsub.f32 %v2692_v10, %v3213_v18  ;;  %v3212_v8 = vand.u32 4294901760, %v2722_v63  ;;  %v2771_v47 = vand.u32 4294901760, %v998_v21  ;;  %v3221_v18 = vand.u32 4294901760, %v2764_v51 }
 0x1b9   :  { %1221 = vmatpush.msrb.mxu3 %v2603_v9  ;;  %1178 = vmatpush.msrb.mxu2 %v2662_v59 }
 0x1ba   :  { %1017 = vmatpush.msrb.mxu0 %v2554_v22  ;;  %1098 = vmatpush.msrb.mxu1 %v1097_v37  ;;  %v1115_v6 = vand.u32 4294901760, %v1114_v32  ;;  %v1126_v37 = vsub.f32 %v2722_v63, %v3212_v8  ;;  %v1121_v32 = vand.u32 4294901760, %v1120_v5  ;;  %v1132_v8 = vsub.f32 %v2734_v28, %v3215_v13 }
 0x1bb   :  { %1223 = vmatpush.msrb.mxu3 %v2632_v20  ;;  %1181 = vmatpush.msrb.mxu2 %v2677_v12  ;;  %v2799_v33 = vsub.f32 %v998_v21, %v2771_v47  ;;  %v1138_v13 = vsub.f32 %v2749_v3, %v3218_v52  ;;  %v3225_v21 = vand.u32 4294901760, %v2784_v19  ;;  %v1144_v52 = vsub.f32 %v2764_v51, %v3221_v18  ;;  %v992_v18 = vld [vmem:[%s3175_s2 + $0xc0] sm:$0xff] }
 0x1bc   :  { %1019 = vmatpush.msrb.mxu0 %v2568_v43  ;;  %1104 = vmatpush.msrb.mxu1 %v1103_v7  ;;  %v2786_v7 = vand.u32 4294901760, %v997_v0  ;;  %v1127_v5 = vand.u32 4294901760, %v1126_v37  ;;  %v1133_v37 = vand.u32 4294901760, %v1132_v8  ;;  %v2831_v8 = vand.u32 4294901760, %v994_v25 }
 0x1bd   :  { %1225 = vmatpush.msrb.mxu3 %v2648_v53  ;;  %1184 = vmatpush.msrb.mxu2 %v2692_v10  ;;  %v1395_v2 = vsub.f32 %v2784_v19, %v3225_v21 }
 0x1be   :  { %1021 = vmatpush.msrb.mxu0 %v2582_v31  ;;  %1110 = vmatpush.msrb.mxu1 %v1109_v14  ;;  %v2801_v14 = vand.u32 4294901760, %v996_v36  ;;  %v2814_v48 = vsub.f32 %v997_v0, %v2786_v7  ;;  %v3227_v0 = vand.u32 4294901760, %v2799_v33  ;;  %v2856_v58 = vsub.f32 %v994_v25, %v2831_v8 }
 0x1bf   :  { %1227 = vmatpush.msrb.mxu3 %v2664_v50  ;;  %1187 = vmatpush.msrb.mxu2 %v2707_v15 }
 0x1c0   :  { %1023 = vmatpush.msrb.mxu0 %v2589_v42  ;;  %1116 = vmatpush.msrb.mxu1 %v1115_v6  ;;  %v2816_v6 = vand.u32 4294901760, %v995_v11  ;;  %v2829_v1 = vsub.f32 %v996_v36, %v2801_v14  ;;  %v3229_v36 = vand.u32 4294901760, %v2814_v48  ;;  %v1401_v39 = vsub.f32 %v2799_v33, %v3227_v0 }
 0x1c1   :  { %1229 = vmatpush.msrb.mxu3 %v2679_v34  ;;  %1190 = vmatpush.msrb.mxu2 %v2722_v63 }
 0x1c2   :  { %1025 = vmatpush.msrb.mxu0 %v2603_v9  ;;  %1122 = vmatpush.msrb.mxu1 %v1121_v32  ;;  %v1139_v32 = vand.u32 4294901760, %v1138_v13  ;;  %v2844_v41 = vsub.f32 %v995_v11, %v2816_v6  ;;  %v2846_v13 = vand.u32 4294901760, %v993_v60  ;;  %v1412_v21 = vand.u32 4294901760, %v2829_v1 }
 0x1c3   :  { %1231 = vmatpush.msrb.mxu3 %v2694_v17  ;;  %1193 = vmatpush.msrb.mxu2 %v2734_v28  ;;  %v2858_v11 = vand.u32 4294901760, %v992_v18  ;;  %v1402_v25 = vand.u32 4294901760, %v1401_v39 }
 0x1c4   :  { %1027 = vmatpush.msrb.mxu0 %v2632_v20  ;;  %1128 = vmatpush.msrb.mxu1 %v1127_v5  ;;  %v1145_v5 = vand.u32 4294901760, %v1144_v52  ;;  %v1396_v52 = vand.u32 4294901760, %v1395_v2  ;;  %v3230_v0 = vand.u32 4294901760, %v2844_v41  ;;  %v2868_v16 = vsub.f32 %v993_v60, %v2846_v13 }
 0x1c5   :  { %1233 = vmatpush.msrb.mxu3 %v2709_v62  ;;  %1196 = vmatpush.msrb.mxu2 %v2749_v3  ;;  %v1413_v2 = vsub.f32 %v2829_v1, %v1412_v21 }
 0x1c6   :  { %1029 = vmatpush.msrb.mxu0 %v2648_v53  ;;  %1134 = vmatpush.msrb.mxu1 %v1133_v37  ;;  %v1407_v37 = vsub.f32 %v2814_v48, %v3229_v36  ;;  %v2878_v36 = vsub.f32 %v992_v18, %v2858_v11  ;;  %v1419_v39 = vsub.f32 %v2844_v41, %v3230_v0  ;;  %v1430_v60 = vand.u32 4294901760, %v2868_v16  ;;  %v991_v18 = vld [vmem:[%s3175_s2 + $0xb8] sm:$0xff] }
 0x1c7   :  { %1235 = vmatpush.msrb.mxu3 %v2724_v38  ;;  %1199 = vmatpush.msrb.mxu2 %v2764_v51 }
 0x1c8   :  { %1031 = vmatpush.msrb.mxu0 %v2664_v50  ;;  %1140 = vmatpush.msrb.mxu1 %v1139_v32  ;;  %v1424_v32 = vand.u32 4294901760, %v2856_v58  ;;  %v1420_v0 = vand.u32 4294901760, %v1419_v39  ;;  %v990_v39 = vld [vmem:[%s3175_s2 + $0xb0] sm:$0xff] }
 0x1c9   :  { %1352 = vmatpush.msra.mxu2 %v2756_v56  ;;  %1237 = vmatpush.msrb.mxu3 %v2736_v27 }
 0x1ca   :  { %1033 = vmatpush.msrb.mxu0 %v2679_v34  ;;  %1146 = vmatpush.msrb.mxu1 %v1145_v5  ;;  %v1425_v5 = vsub.f32 %v2856_v58, %v1424_v32 }
 0x1cb   :  { %1397 = vmatpush.msra.mxu3 %v1396_v52  ;;  %1354 = vmatpush.msra.mxu2 %v2771_v47  ;;  %v1436_v52 = vand.u32 4294901760, %v2878_v36 }
 0x1cc   :  { %1035 = vmatpush.msrb.mxu0 %v2694_v17  ;;  %1315 = vmatpush.msra.mxu1 %v2520_v44  ;;  %v1408_v44 = vand.u32 4294901760, %v1407_v37  ;;  %v3271_v37 = vand.u32 4294901760, %v2541_v45  ;;  %v1426_v45 = vand.u32 4294901760, %v1425_v5  ;;  %v3274_v5 = vand.u32 4294901760, %v2580_v26 }
 0x1cd   :  { %1403 = vmatpush.msra.mxu3 %v1402_v25  ;;  %1356 = vmatpush.msra.mxu2 %v2786_v7  ;;  %v2904_v25 = vand.u32 4294901760, %v991_v18  ;;  %v3275_v26 = vand.u32 4294901760, %v2599_v29  ;;  %v3276_v29 = vand.u32 4294901760, %v2616_v23  ;;  %v3277_v23 = vand.u32 4294901760, %v2621_v24 }
 0x1ce   :  { %1037 = vmatpush.msrb.mxu0 %v2709_v62  ;;  %1317 = vmatpush.msra.mxu1 %v2530_v35  ;;  %v1414_v35 = vand.u32 4294901760, %v1413_v2  ;;  %v3272_v2 = vand.u32 4294901760, %v2552_v55  ;;  %v3278_v24 = vand.u32 4294901760, %v2637_v49  ;;  %v3279_v49 = vand.u32 4294901760, %v2662_v59 }
 0x1cf   :  { %1409 = vmatpush.msra.mxu3 %v1408_v44  ;;  %1358 = vmatpush.msra.mxu2 %v2801_v14  ;;  %v3273_v44 = vand.u32 4294901760, %v2566_v30  ;;  %v989_v30 = vld [vmem:[%s3175_s2 + $0xa8] sm:$0xff]  ;;  %v3280_v59 = vand.u32 4294901760, %v2677_v12 }
 0x1d0   :  { %1039 = vmatpush.msrb.mxu0 %v2724_v38  ;;  %1319 = vmatpush.msra.mxu1 %v2543_v57  ;;  %v1431_v57 = vsub.f32 %v2868_v16, %v1430_v60 }
 0x1d1   :  { %1415 = vmatpush.msra.mxu3 %v1414_v35  ;;  %1360 = vmatpush.msra.mxu2 %v2816_v6  ;;  %v2923_v35 = vsub.f32 %v991_v18, %v2904_v25 }
 0x1d2   :  { %1041 = vmatpush.msrb.mxu0 %v2736_v27  ;;  %1321 = vmatpush.msra.mxu1 %v2554_v22  ;;  %v1437_v22 = vsub.f32 %v2878_v36, %v1436_v52  ;;  %v1432_v55 = vand.u32 4294901760, %v1431_v57  ;;  %v988_v57 = vld [vmem:[%s3175_s2 + $0xa0] sm:$0xff] }
 0x1d3   :  { %1421 = vmatpush.msra.mxu3 %v1420_v0  ;;  %1362 = vmatpush.msra.mxu2 %v2831_v8  ;;  %v1442_v0 = vand.u32 4294901760, %v2923_v35 }
 0x1d4   :  { %1248 = vmatpush.msra.mxu0 %v3271_v37  ;;  %1323 = vmatpush.msra.mxu1 %v2568_v43  ;;  %v2920_v43 = vand.u32 4294901760, %v990_v39  ;;  %v2933_v37 = vand.u32 4294901760, %v989_v30 }
 0x1d5   :  { %1427 = vmatpush.msra.mxu3 %v1426_v45  ;;  %1364 = vmatpush.msra.mxu2 %v2846_v13  ;;  %v2949_v45 = vand.u32 4294901760, %v988_v57 }
 0x1d6   :  { %1252 = vmatpush.msra.mxu0 %v3272_v2  ;;  %1325 = vmatpush.msra.mxu1 %v2582_v31  ;;  %v1438_v31 = vand.u32 4294901760, %v1437_v22  ;;  %v2936_v18 = vsub.f32 %v990_v39, %v2920_v43  ;;  %v2952_v22 = vsub.f32 %v989_v30, %v2933_v37 }
 0x1d7   :  { %1433 = vmatpush.msra.mxu3 %v1432_v55  ;;  %1366 = vmatpush.msra.mxu2 %v2858_v11  ;;  %v2971_v30 = vsub.f32 %v988_v57, %v2949_v45 }
 0x1d8   :  { %1256 = vmatpush.msra.mxu0 %v3273_v44  ;;  %1327 = vmatpush.msra.mxu1 %v2589_v42  ;;  %v1443_v42 = vsub.f32 %v2923_v35, %v1442_v0  ;;  %v1448_v2 = vand.u32 4294901760, %v2936_v18  ;;  %v1454_v55 = vand.u32 4294901760, %v2952_v22 }
 0x1d9   :  { %1439 = vmatpush.msra.mxu3 %v1438_v31  ;;  %1368 = vmatpush.msra.mxu2 %v2904_v25  ;;  %v1460_v57 = vand.u32 4294901760, %v2971_v30 }
 0x1da   :  { %1260 = vmatpush.msra.mxu0 %v3274_v5  ;;  %1329 = vmatpush.msra.mxu1 %v2603_v9  ;;  %v987_v9 = vld [vmem:[%s3175_s2 + $0x98] sm:$0xff]  ;;  %v1444_v44 = vand.u32 4294901760, %v1443_v42  ;;  %v1449_v39 = vsub.f32 %v2936_v18, %v1448_v2 }
 0x1db   :  { %v2965_v5 = vand.u32 4294901760, %v987_v9  ;;  %1370 = vmatpush.msra.mxu2 %v2920_v43 }
 0x1dc   :  { %1264 = vmatpush.msra.mxu0 %v3275_v26  ;;  %1331 = vmatpush.msra.mxu1 %v2632_v20  ;;  %v986_v20 = vld [vmem:[%s3175_s2 + $0x90] sm:$0xff]  ;;  %v1450_v31 = vand.u32 4294901760, %v1449_v39  ;;  %v1455_v26 = vsub.f32 %v2952_v22, %v1454_v55 }
 0x1dd   :  { %1445 = vmatpush.msra.mxu3 %v1444_v44  ;;  %v2980_v42 = vand.u32 4294901760, %v986_v20  ;;  %1372 = vmatpush.msra.mxu2 %v2933_v37 }
 0x1de   :  { %1268 = vmatpush.msra.mxu0 %v3276_v29  ;;  %1333 = vmatpush.msra.mxu1 %v2648_v53  ;;  %v2987_v29 = vsub.f32 %v987_v9, %v2965_v5  ;;  %v985_v53 = vld [vmem:[%s3175_s2 + $0x88] sm:$0xff]  ;;  %v1456_v44 = vand.u32 4294901760, %v1455_v26  ;;  %v1461_v9 = vsub.f32 %v2971_v30, %v1460_v57 }
 0x1df   :  { %1451 = vmatpush.msra.mxu3 %v1450_v31  ;;  %v2993_v39 = vand.u32 4294901760, %v985_v53  ;;  %1374 = vmatpush.msra.mxu2 %v2949_v45 }
 0x1e0   :  { %1272 = vmatpush.msra.mxu0 %v3277_v23  ;;  %1335 = vmatpush.msra.mxu1 %v2664_v50  ;;  %v2996_v23 = vsub.f32 %v986_v20, %v2980_v42  ;;  %v984_v20 = vld [vmem:[%s3175_s2 + $0x80] sm:$0xff]  ;;  %v1462_v31 = vand.u32 4294901760, %v1461_v9  ;;  %s1836_s2 = smov [#allocation2]  }
 0x1e1   :  { %1457 = vmatpush.msra.mxu3 %v1456_v44  ;;  %1376 = vmatpush.msra.mxu2 %v2965_v5  ;;  %s1734_s13 = sshll.u32 %s1836_s2, 4  ;;  %s1735_s13 = int_to_ptr.vmem [resolvable:$true] %s1734_s13 }
 0x1e2   :  { %1276 = vmatpush.msra.mxu0 %v3278_v24  ;;  %v3231_v24 = vand.u32 4294901760, %v2987_v29  ;;  %1337 = vmatpush.msra.mxu1 %v2679_v34  ;;  %v1472_v50 = vand.u32 4294901760, %v2996_v23  ;;  %v3019_v34 = vsub.f32 %v985_v53, %v2993_v39  ;;  %v3281_v53 = vand.u32 4294901760, %v2692_v10 }
 0x1e3   :  { %1463 = vmatpush.msra.mxu3 %v1462_v31  ;;  %1378 = vmatpush.msra.mxu2 %v2980_v42 }
 0x1e4   :  { %1280 = vmatpush.msra.mxu0 %v3279_v49  ;;  %v1467_v26 = vsub.f32 %v2987_v29, %v3231_v24  ;;  %v3016_v49 = vand.u32 4294901760, %v984_v20  ;;  %1339 = vmatpush.msra.mxu1 %v2694_v17  ;;  %v1473_v44 = vsub.f32 %v2996_v23, %v1472_v50  ;;  %v1478_v9 = vand.u32 4294901760, %v3019_v34 }
 0x1e5   :  { %1380 = vmatpush.msra.mxu2 %v2993_v39 }
 0x1e6   :  { %1284 = vmatpush.msra.mxu0 %v3280_v59  ;;  %v1468_v12 = vand.u32 4294901760, %v1467_v26  ;;  %v3028_v59 = vsub.f32 %v984_v20, %v3016_v49  ;;  %1341 = vmatpush.msra.mxu1 %v2709_v62  ;;  %v1474_v24 = vand.u32 4294901760, %v1473_v44  ;;  %v1479_v17 = vsub.f32 %v3019_v34, %v1478_v9 }
 0x1e7   :  { %v3282_v20 = vand.u32 4294901760, %v2707_v15  ;;  %v3283_v26 = vand.u32 4294901760, %v2722_v63  ;;  %1382 = vmatpush.msra.mxu2 %v3016_v49  ;;  %v3284_v15 = vand.u32 4294901760, %v2734_v28  ;;  %v3286_v44 = vand.u32 4294901760, %v2764_v51 }
 0x1e8   :  { %1288 = vmatpush.msra.mxu0 %v3281_v53  ;;  %1469 = vmatpush.msra.mxu3 %v1468_v12  ;;  %v1484_v31 = vand.u32 4294901760, %v3028_v59  ;;  %v1480_v10 = vand.u32 4294901760, %v1479_v17 }
 0x1e9   :  { %1343 = vmatpush.msra.mxu1 %v2724_v38 }
 0x1ea   :  { %1292 = vmatpush.msra.mxu0 %v3282_v20  ;;  %1475 = vmatpush.msra.mxu3 %v1474_v24  ;;  %v1485_v62 = vsub.f32 %v3028_v59, %v1484_v31  ;;  %v3285_v24 = vand.u32 4294901760, %v2749_v3 }
 0x1eb   :  { %1345 = vmatpush.msra.mxu1 %v2736_v27 }
 0x1ec   :  { %1296 = vmatpush.msra.mxu0 %v3283_v26  ;;  %1481 = vmatpush.msra.mxu3 %v1480_v10  ;;  %v1486_v38 = vand.u32 4294901760, %v1485_v62 }
 0x1ee   :  { %1300 = vmatpush.msra.mxu0 %v3284_v15  ;;  %1487 = vmatpush.msra.mxu3 %v1486_v38 }
 0x1f0   :  { %1304 = vmatpush.msra.mxu0 %v3285_v24 }
 0x1f2   :  { %1308 = vmatpush.msra.mxu0 %v3286_v44 }
 0x207   :  { %v952_v27 = vpop.permute.xlu1 %951  ;;  %v950_v12 = vpop.permute.xlu0 %949 }
 0x208   :  { %v954_v63 = vsel %vm953_vm5, %v950_v12, %v952_v27  ;;  %v955_v53 = vsel %vm953_vm5, %v952_v27, %v950_v12  ;;  %v3288_v12 = vand.u32 4294901760, %v2799_v33 }
 0x209   :  { %v958_v17 = vrot.slane %v954_v63, 1  ;;  %v959_v20 = vrot.slane %v955_v53, 1  ;;  %v964_v62 = vmax.f32 %v2455_v40, %v954_v63  ;;  %v965_v3 = vmax.f32 %v2458_v61, %v955_v53 }
 0x20a   :  { %v3287_v61 = vand.u32 4294901760, %v2784_v19 }
 0x20b   :  { %v966_v10 = vmax.f32 %v2447_v4, %v958_v17  ;;  %v967_v28 = vmax.f32 %v2450_v54, %v959_v20  ;;  %v3289_v17 = vand.u32 4294901760, %v2814_v48 }
 0x20d   :  { %v1004_v26 = vrot.slane %v966_v10, 7  ;;  %v1006_v38 = vrot.slane %v967_v28, 7  ;;  %v363_v28 = vpop.f32.mrf.mxu2 }
 0x20f   :  { %v1005_v51 = vsel %vm165_vm1, %v1004_v26, %v964_v62  ;;  %v1007_v46 = vsel %vm165_vm1, %v1006_v38, %v965_v3  ;;  %v208_v10 = vpop.f32.mrf.mxu0 }
 0x210   :  { %v3062_v15 = vand.u32 4294901760, %v1007_v46  ;;  %v1042_v24 = vand.u32 4294901760, %v1005_v51 }
 0x212   :  { %v3065_v44 = vsub.f32 %v1007_v46, %v3062_v15  ;;  %1148 = vmatmul.f32.vlgmr.msrb.gmra.mxu1 %v1042_v24  ;;  %v1043_v4 = vsub.f32 %v1005_v51, %v1042_v24 }
 0x213   :  { %1548 = vmatpush.msrb.mxu1 %v2756_v56 }
 0x214   :  { %1202 = vmatmul.f32.vlgmr.msrb.gmra.mxu2 %v1043_v4  ;;  %v1044_v54 = vand.u32 4294901760, %v1043_v4  ;;  %v1385_v40 = vand.u32 4294901760, %v3065_v44 }
 0x215   :  { %1550 = vmatpush.msrb.mxu1 %v2771_v47  ;;  %1589 = vmatpush.msrb.mxu2 %v3287_v61 }
 0x216   :  { %1241 = vmatmul.f32.vlgmr.msrb.gmra.mxu3 %v1044_v54  ;;  %v1045_v27 = vsub.f32 %v1043_v4, %v1044_v54  ;;  %v1386_v63 = vsub.f32 %v3065_v44, %v1385_v40 }
 0x217   :  { %1552 = vmatpush.msrb.mxu1 %v2786_v7  ;;  %1593 = vmatpush.msrb.mxu2 %v3288_v12 }
 0x218   :  { %1656 = vmatpush.msrb.mxu3 %v2756_v56  ;;  %v1046_v53 = vand.u32 4294901760, %v1045_v27  ;;  %v1387_v20 = vand.u32 4294901760, %v1386_v63  ;;  %v309_v56 = vpop.f32.mrf.mxu1 }
 0x219   :  { %1554 = vmatpush.msrb.mxu1 %v2801_v14  ;;  %1597 = vmatpush.msrb.mxu2 %v3289_v17  ;;  %v310_v62 = vadd.f32 %v309_v56, %v208_v10 }
 0x21a   :  { %1658 = vmatpush.msrb.mxu3 %v2771_v47  ;;  %1047 = vmatmul.f32.vlgmr.msrb.gmra.mxu0 %v1046_v53  ;;  %v3290_v47 = vand.u32 4294901760, %v2844_v41 }
 0x21b   :  { %1347 = vmatmul.f32.vlgmr.msra.gmra.mxu1 %v1042_v24  ;;  %1495 = vmatpush.msrb.mxu0 %v2784_v19  ;;  %v364_v19 = vadd.f32 %v363_v28, %v310_v62 }
 0x21c   :  { %1556 = vmatpush.msrb.mxu1 %v2816_v6  ;;  %1601 = vmatpush.msrb.mxu2 %v1412_v21  ;;  %v402_v21 = vpop.f32.mrf.mxu3 }
 0x21d   :  { %1660 = vmatpush.msrb.mxu3 %v2786_v7  ;;  %1388 = vmatmul.f32.vlgmr.msra.gmra.mxu2 %v1387_v20  ;;  %v403_v7 = vadd.f32 %v402_v21, %v364_v19 }
 0x21e   :  { %1498 = vmatpush.msrb.mxu0 %v2799_v33  ;;  %1558 = vmatpush.msrb.mxu1 %v2831_v8 }
 0x21f   :  { %1605 = vmatpush.msrb.mxu2 %v3290_v47  ;;  %1662 = vmatpush.msrb.mxu3 %v2801_v14 }
 0x220   :  { %1489 = vmatmul.f32.vlgmr.msra.gmra.mxu3 %v3062_v15  ;;  %1501 = vmatpush.msrb.mxu0 %v2814_v48  ;;  %v471_v48 = vpop.f32.mrf.mxu0 }
 0x221   :  { %1560 = vmatpush.msrb.mxu1 %v2846_v13  ;;  %1609 = vmatpush.msrb.mxu2 %v1424_v32  ;;  %v549_v33 = vpop.f32.mrf.mxu2 }
 0x222   :  { %1664 = vmatpush.msrb.mxu3 %v2816_v6  ;;  %1504 = vmatpush.msrb.mxu0 %v2829_v1  ;;  %v472_v1 = vadd.f32 %v471_v48, %v403_v7  ;;  %v3291_v6 = vand.u32 4294901760, %v2987_v29 }
 0x223   :  { %1562 = vmatpush.msrb.mxu1 %v2858_v11  ;;  %1613 = vmatpush.msrb.mxu2 %v1430_v60 }
 0x224   :  { %1666 = vmatpush.msrb.mxu3 %v2831_v8  ;;  %1310 = vmatmul.f32.vlgmr.msra.gmra.mxu0 %v1042_v24  ;;  %v650_v14 = vpop.f32.mrf.mxu3 }
 0x225   :  { %1507 = vmatpush.msrb.mxu0 %v2844_v41  ;;  %1564 = vmatpush.msrb.mxu1 %v2904_v25  ;;  %v508_v41 = vpop.f32.mrf.mxu1 }
 0x226   :  { %1617 = vmatpush.msrb.mxu2 %v1436_v52  ;;  %1668 = vmatpush.msrb.mxu3 %v2846_v13 }
 0x227   :  { %1510 = vmatpush.msrb.mxu0 %v2856_v58  ;;  %1566 = vmatpush.msrb.mxu1 %v2920_v43  ;;  %v509_v58 = vadd.f32 %v508_v41, %v472_v1 }
 0x228   :  { %1621 = vmatpush.msrb.mxu2 %v1442_v0  ;;  %1670 = vmatpush.msrb.mxu3 %v2858_v11 }
 0x229   :  { %1513 = vmatpush.msrb.mxu0 %v2868_v16  ;;  %1568 = vmatpush.msrb.mxu1 %v2933_v37  ;;  %v550_v16 = vadd.f32 %v549_v33, %v509_v58  ;;  %v812_v32 = vpop.f32.mrf.mxu2 }
 0x22a   :  { %1625 = vmatpush.msrb.mxu2 %v1448_v2  ;;  %1672 = vmatpush.msrb.mxu3 %v2904_v25 }
 0x22b   :  { %1516 = vmatpush.msrb.mxu0 %v2878_v36  ;;  %1570 = vmatpush.msrb.mxu1 %v2949_v45  ;;  %v651_v8 = vadd.f32 %v650_v14, %v550_v16 }
 0x22c   :  { %1629 = vmatpush.msrb.mxu2 %v1454_v55  ;;  %1674 = vmatpush.msrb.mxu3 %v2920_v43  ;;  %v849_v52 = vpop.f32.mrf.mxu3 }
 0x22d   :  { %1519 = vmatpush.msrb.mxu0 %v2923_v35  ;;  %1572 = vmatpush.msrb.mxu1 %v2965_v5  ;;  %v743_v13 = vpop.f32.mrf.mxu1 }
 0x22e   :  { %1633 = vmatpush.msrb.mxu2 %v1460_v57  ;;  %1676 = vmatpush.msrb.mxu3 %v2933_v37 }
 0x22f   :  { %1522 = vmatpush.msrb.mxu0 %v2936_v18  ;;  %1574 = vmatpush.msrb.mxu1 %v2980_v42 }
 0x230   :  { %1637 = vmatpush.msrb.mxu2 %v3291_v6  ;;  %1678 = vmatpush.msrb.mxu3 %v2949_v45  ;;  %v704_v36 = vpop.f32.mrf.mxu0 }
 0x231   :  { %1525 = vmatpush.msrb.mxu0 %v2952_v22  ;;  %1576 = vmatpush.msrb.mxu1 %v2993_v39  ;;  %v705_v11 = vadd.f32 %v704_v36, %v651_v8 }
 0x232   :  { %1641 = vmatpush.msrb.mxu2 %v1472_v50  ;;  %1680 = vmatpush.msrb.mxu3 %v2965_v5 }
 0x233   :  { %1528 = vmatpush.msrb.mxu0 %v2971_v30  ;;  %1578 = vmatpush.msrb.mxu1 %v3016_v49  ;;  %v744_v60 = vadd.f32 %v743_v13, %v705_v11 }
 0x234   :  { %1645 = vmatpush.msrb.mxu2 %v1478_v9  ;;  %1682 = vmatpush.msrb.mxu3 %v2980_v42 }
 0x235   :  { %1582 = vmatmul.f32.vlgmr.msrb.gmra.mxu1 %v1385_v40  ;;  %1531 = vmatpush.msrb.mxu0 %v2987_v29  ;;  %v813_v25 = vadd.f32 %v812_v32, %v744_v60 }
 0x236   :  { %1649 = vmatpush.msrb.mxu2 %v1484_v31  ;;  %1684 = vmatpush.msrb.mxu3 %v2993_v39 }
 0x237   :  { %1651 = vmatmul.f32.vlgmr.msrb.gmra.mxu2 %v3062_v15  ;;  %1534 = vmatpush.msrb.mxu0 %v2996_v23  ;;  %v850_v43 = vadd.f32 %v849_v52, %v813_v25 }
 0x238   :  { %1686 = vmatpush.msrb.mxu3 %v3016_v49 }
 0x239   :  { %1688 = vmatmul.f32.vlgmr.msrb.gmra.mxu3 %v3062_v15  ;;  %1537 = vmatpush.msrb.mxu0 %v3019_v34  ;;  %v1697_v35 = vrot.slane %v850_v43, 1  ;;  %1700 = vst.msk [vmem:[#allocation2] sm:$0x1] %vm1699_vm6, %v850_v43 }
 0x23b   :  { %1540 = vmatpush.msrb.mxu0 %v3028_v59  ;;  %1701 = vst.msk [vmem:[#allocation2 + $0x1] sm:$0x1] %vm1699_vm6, %v1697_v35 }
 0x23c   :  { %1543 = vmatmul.f32.vlgmr.msrb.gmra.mxu0 %v3065_v44  ;;  %1742 = dma.vmem_to_hbm [thread:$0]  %s1735_s13, 32, %s1737_s16, [#allocation3], %s1837_s17, %s1837_s17, %s1838_s18  }
 0x28f   :  { %v1149_v37 = vpop.f32.mrf.mxu1 }
 0x297   :  { %v1048_v0 = vpop.f32.mrf.mxu0  ;;  %v1203_v2 = vpop.f32.mrf.mxu2 }
 0x298   :  { %v1150_v18 = vadd.f32 %v1149_v37, %v1048_v0  ;;  %v1348_v42 = vpop.f32.mrf.mxu1 }
 0x299   :  { %v1242_v22 = vpop.f32.mrf.mxu3 }
 0x29a   :  { %v1204_v45 = vadd.f32 %v1203_v2, %v1150_v18 }
 0x29c   :  { %v1243_v5 = vadd.f32 %v1242_v22, %v1204_v45 }
 0x2a0   :  { %v1389_v29 = vpop.f32.mrf.mxu2 }
 0x2a1   :  { %v1311_v55 = vpop.f32.mrf.mxu0 }
 0x2a2   :  { %v1312_v30 = vadd.f32 %v1311_v55, %v1243_v5 }
 0x2a3   :  { %v1490_v23 = vpop.f32.mrf.mxu3 }
 0x2a4   :  { %v1349_v57 = vadd.f32 %v1348_v42, %v1312_v30 }
 0x2a6   :  { %v1390_v39 = vadd.f32 %v1389_v29, %v1349_v57 }
 0x2a8   :  { %v1491_v50 = vadd.f32 %v1490_v23, %v1390_v39 }
 0x2b2   :  { %v1583_v9 = vpop.f32.mrf.mxu1 }
 0x2b9   :  { %v1544_v49 = vpop.f32.mrf.mxu0 }
 0x2ba   :  { %v1545_v34 = vadd.f32 %v1544_v49, %v1491_v50  ;;  %v1652_v31 = vpop.f32.mrf.mxu2 }
 0x2bc   :  { %v1584_v59 = vadd.f32 %v1583_v9, %v1545_v34  ;;  %v1689_v26 = vpop.f32.mrf.mxu3 }
 0x2be   :  { %v1653_v3 = vadd.f32 %v1652_v31, %v1584_v59 }
 0x2c0   :  { %v1690_v38 = vadd.f32 %v1689_v26, %v1653_v3 }
 0x2c2   :  { %v1703_v51 = vrot.slane %v1690_v38, 1  ;;  %1705 = vst.msk [vmem:[#allocation4] sm:$0x1] %vm1699_vm6, %v1690_v38 }
 0x2c4   :  { %1706 = vst.msk [vmem:[#allocation4 + $0x1] sm:$0x1] %vm1699_vm6, %v1703_v51 }
 0x2c5   :  { %1755 = dma.vmem_to_hbm [thread:$0]  %s1748_s0, 32, %s1750_s21, [#allocation5], %s1837_s17, %s1837_s17, %s1838_s18  }
 0x2c6   :  { %1828 = dma.done.wait [#allocation3], 32  }
 0x2c7   :  { %1829 = vsyncadd [#allocation3], 4294967264 }
 0x2c8   :  { %1830 = dma.done.wait [#allocation5], 32  }
 0x2c9   :  { %1831 = vsyncadd [#allocation5], 4294967264 }
 0x2ca   :  { %1764 = vsyncpa [#allocation3], 1 }
 0x2cb   :  { %1765 = vsyncpa [#allocation5], 1 }

</bundles_post_ra>
